<compile_context>
chip_gen: v7x
topology: tpu7x:2x2x1
jax: 0.10.0
libtpu: 0.0.40
codegen_flags: <defaults>
</compile_context>

<pallas_src>
import math

import jax
import jax.numpy as jnp
from jax.experimental import pallas as pl
from jax.experimental.pallas import tpu as pltpu

# Keep reference (XLA) and kernel (Mosaic) f32 matmuls at full precision so the
# numerical comparison is meaningful; production would use bf16 weights instead.
jax.config.update("jax_default_matmul_precision", "highest")

PAD_TOKEN = 0
_LANE = 128
_SUBLANE = 8


def _round_up(n, m):
    return ((n + m - 1) // m) * m


# ----------------------------- Pallas kernel --------------------------------
def _decode_step_kernel(xg_ref, h0_ref, c0_ref, enc_ref, uenc_ref, mask_ref,
                        whf_ref, wic_ref, wout_ref, v_ref, bout_ref,
                        logp_ref, attn_ref, hT_ref, cT_ref,
                        h_sc, c_sc):
    f32 = jnp.float32
    t = pl.program_id(0)
    enc = enc_ref[...]                        # (B, LP, H), VMEM-resident
    B, LP, H = enc.shape

    # recurrent state lives in VMEM scratch across the time grid
    @pl.when(t == 0)
    def _():
        h_sc[...] = h0_ref[...]
        c_sc[...] = c0_ref[...]

    h = h_sc[...]                             # (B, H)
    c = c_sc[...]                             # (B, H)

    # ---- single fused MXU push for everything fed by h ----------------------
    # whf = [whh^T | wW^T]  ->  h_fused = [hh_gates (4H) | Wh (H)]
    h_fused = jnp.dot(h, whf_ref[...], preferred_element_type=f32)    # (B, 5H)
    hh_gates = h_fused[:, :4 * H]             # 128-lane-aligned slice boundary
    Wh = h_fused[:, 4 * H:]                   # (B, H)

    # ---- Bahdanau attention: score = v . tanh(W h + U enc) ------------------
    # Uenc (+ U_b + W_b) is step-invariant, precomputed in the wrapper, resident.
    energy = jnp.tanh(Wh[:, None, :] + uenc_ref[...])                 # (B, LP, H)
    score = jnp.sum(energy * v_ref[...][:, None, :], axis=-1)         # (B, LP)
    score = score + mask_ref[...]             # -1e9 on padded / masked positions

    m = jnp.max(score, axis=-1, keepdims=True)
    e = jnp.exp(score - m)
    attn = e / jnp.sum(e, axis=-1, keepdims=True)   # exact divide (per review)
    attn_ref[...] = attn                      # small masked store (LP % 8 == 0)

    # context vector (padded / masked positions contribute exactly zero)
    # TODO(synk): at realistic L*H contract LP on the MXU via a batched
    # dot_general; kept elementwise (VPU+XLU) here since the degenerate
    # (B,1,LP)x(B,LP,H) batched matmul is a lowering risk at these shapes.
    context = jnp.sum(attn[:, :, None] * enc, axis=1)                 # (B, H)

    # ---- single-step LSTM cell (PyTorch gate order i, f, g, o) --------------
    # xg_ref holds emb @ wih_emb^T + (bih + bhh), precomputed per step.
    gates = (xg_ref[...] + hh_gates
             + jnp.dot(context, wic_ref[...], preferred_element_type=f32))
    i_g = jax.nn.sigmoid(gates[:, 0:H])
    f_g = jax.nn.sigmoid(gates[:, H:2 * H])
    g_g = jnp.tanh(gates[:, 2 * H:3 * H])
    o_g = jax.nn.sigmoid(gates[:, 3 * H:4 * H])
    c_new = f_g * c + i_g * g_g
    h_new = o_g * jnp.tanh(c_new)
    h_sc[...] = h_new
    c_sc[...] = c_new
    hT_ref[...] = h_new                       # constant index map: last step persists
    cT_ref[...] = c_new

    # ---- output projection + log-softmax (vocab lane-padded; pad bias -1e9) -
    logits = jnp.dot(h_new, wout_ref[...], preferred_element_type=f32) + bout_ref[...]
    lmax = jnp.max(logits, axis=-1, keepdims=True)
    lse = jnp.log(jnp.sum(jnp.exp(logits - lmax), axis=-1, keepdims=True)) + lmax
    logp_ref[...] = logits - lse              # lane-dense store (VP % 128 == 0)


# ------------------------------ JAX wrappers ---------------------------------
def decoder_decode(params, token_seq, h0, c0, encoder_outputs, src_len=None):
    """Fused teacher-forced decode: ONE pallas_call, grid over time steps.

    token_seq:        (T, B)   int32 token ids (one per step)
    h0, c0:           (1, B, H)
    encoder_outputs:  (L, B, H)
    returns (log_probs (T,B,V), (h_T (1,B,H), c_T (1,B,H)), attn (T,B,L))
    """
    T, B = token_seq.shape
    L, _, H = encoder_outputs.shape
    E = params["embedding"].shape[1]
    V = params["out_w"].shape[0]
    LP = _round_up(L, _LANE) if L >= _LANE else _round_up(L, _SUBLANE)
    VP = _round_up(V, _LANE)                  # lane-dense log-prob output

    # ---- plain-JAX glue: gather, transposes, padding, weight packing --------
    # TODO(synk): nn.Dropout is identity in eval mode; training-mode dropout
    # is not implemented.
    emb = jnp.take(params["embedding"], token_seq.reshape(-1), axis=0)
    emb = emb.reshape(T, B, E)
    wih = params["lstm_wih"]                                      # (4H, E+H)
    b_gates = params["lstm_bih"] + params["lstm_bhh"]             # (4H,)
    # embedding-side gate pre-activation for all T steps in one big matmul
    # (removes a latency-bound per-step MXU push); both LSTM biases folded in.
    xg = emb @ wih[:, :E].T + b_gates                             # (T, B, 4H)

    h = h0[0]                                                     # (B, H)
    c = c0[0]                                                     # (B, H)
    enc = jnp.transpose(encoder_outputs, (1, 0, 2))               # (B, L, H)
    enc_pad = jnp.pad(enc, ((0, 0), (0, LP - L), (0, 0)))         # (B, LP, H)

    # step-invariant attention term, hoisted out of the kernel and resident:
    #   Uenc = enc @ U^T + U_b + W_b   (W_b folded in; it broadcasts over L)
    uenc = enc_pad @ params["U_w"].T + (params["U_b"] + params["W_b"])

    # additive score mask: 0 on valid source positions, -1e9 on pad / masked
    pos = jnp.arange(LP)[None, :]
    if src_len is None:
        limit = jnp.full((B, 1), L, jnp.int32)
    else:
        limit = jnp.asarray(src_len, jnp.int32).reshape(B, 1)
    mask = jnp.where(pos < limit, 0.0, -1e9).astype(jnp.float32)  # (B, LP)

    # fused h-side weight: [whh^T | wW^T] -> one (H, 5H) matmul per step
    w_h_fused = jnp.concatenate(
        [params["lstm_whh"].T, params["W_w"].T], axis=1)          # (H, 5H)
    wic = wih[:, E:].T                                            # (H, 4H)

    # output projection padded to a lane-dense vocab; padded columns get a
    # -1e9 bias so they do not perturb the log-softmax.
    wout = jnp.pad(params["out_w"].T, ((0, 0), (0, VP - V)))      # (H, VP)
    bout = jnp.pad(params["out_b"], (0, VP - V),
                   constant_values=-1e9).reshape(1, -1)           # (1, VP)
    v2 = params["v"].reshape(1, -1)                               # (1, H)

    const2 = lambda t: (0, 0)
    const3 = lambda t: (0, 0, 0)
    step3 = lambda t: (t, 0, 0)

    logp_pad, attn_pad, h_T, c_T = pl.pallas_call(
        _decode_step_kernel,
        out_shape=(
            jax.ShapeDtypeStruct((T, B, VP), jnp.float32),
            jax.ShapeDtypeStruct((T, B, LP), jnp.float32),
            jax.ShapeDtypeStruct((B, H), jnp.float32),
            jax.ShapeDtypeStruct((B, H), jnp.float32),
        ),
        grid_spec=pltpu.PrefetchScalarGridSpec(
            num_scalar_prefetch=0,
            grid=(T,),
            in_specs=[
                pl.BlockSpec((None, B, 4 * H), step3),   # xg: streamed per step
                pl.BlockSpec((B, H), const2),            # h0 (read only at t==0)
                pl.BlockSpec((B, H), const2),            # c0
                pl.BlockSpec((B, LP, H), const3),        # enc   (resident)
                pl.BlockSpec((B, LP, H), const3),        # uenc  (resident)
                pl.BlockSpec((B, LP), const2),           # additive score mask
                pl.BlockSpec((H, 5 * H), const2),        # [whh^T | wW^T]
                pl.BlockSpec((H, 4 * H), const2),        # context-side wih
                pl.BlockSpec((H, VP), const2),           # output projection
                pl.BlockSpec((1, H), const2),            # v
                pl.BlockSpec((1, VP), const2),           # out bias (+ pad -1e9)
            ],
            out_specs=(
                pl.BlockSpec((None, B, VP), step3),      # log-probs per step
                pl.BlockSpec((None, B, LP), step3),      # attention per step
                pl.BlockSpec((B, H), const2),            # final h
                pl.BlockSpec((B, H), const2),            # final c
            ),
            scratch_shapes=[pltpu.VMEM((B, H), jnp.float32),   # recurrent h
                            pltpu.VMEM((B, H), jnp.float32)],  # recurrent c
        ),
        compiler_params=pltpu.CompilerParams(
            dimension_semantics=("arbitrary",)),         # time axis is recurrent
    )(xg, h, c, enc_pad, uenc, mask, w_h_fused, wic, wout, v2, bout)

    logp = logp_pad[:, :, :V]
    attn = attn_pad[:, :, :L]
    return logp, (h_T[None], c_T[None]), attn


def decoder_forward(params, input_seq, h0, c0, encoder_outputs, src_len=None):
    """Mirror of DecoderRNN.forward(input_seq, (h0,c0), src_len, encoder_outputs)."""
    logp, hidden, attn = decoder_decode(
        params, input_seq[None, :], h0, c0, encoder_outputs, src_len)
    return logp[0], hidden, attn[0][:, None, :]        # attn_weights (B, 1, L)


# -------------------------- pure-JAX reference -------------------------------
def reference_forward(params, input_seq, h0, c0, encoder_outputs, src_len=None):
    emb = jnp.take(params["embedding"], input_seq, axis=0)
    h, c = h0[0], c0[0]
    enc = jnp.transpose(encoder_outputs, (1, 0, 2))              # (B, L, H)
    L = enc.shape[1]
    H = h.shape[1]

    Wh = h @ params["W_w"].T + params["W_b"]
    Uenc = enc @ params["U_w"].T + params["U_b"]
    energy = jnp.tanh(Wh[:, None, :] + Uenc)
    score = jnp.einsum("blh,h->bl", energy, params["v"][0])
    if src_len is not None:
        pos = jnp.arange(L)[None, :]
        limit = jnp.asarray(src_len, jnp.int32).reshape(-1, 1)
        score = jnp.where(pos < limit, score, -1e9)              # masked_fill
    attn = jax.nn.softmax(score, axis=-1)
    context = jnp.einsum("bl,blh->bh", attn, enc)

    x = jnp.concatenate([emb, context], axis=1)
    gates = (x @ params["lstm_wih"].T + params["lstm_bih"]
             + h @ params["lstm_whh"].T + params["lstm_bhh"])
    i_g = jax.nn.sigmoid(gates[:, 0:H])
    f_g = jax.nn.sigmoid(gates[:, H:2 * H])
    g_g = jnp.tanh(gates[:, 2 * H:3 * H])
    o_g = jax.nn.sigmoid(gates[:, 3 * H:4 * H])
    c_new = f_g * c + i_g * g_g
    h_new = o_g * jnp.tanh(c_new)

    logits = h_new @ params["out_w"].T + params["out_b"]
    logp = jax.nn.log_softmax(logits, axis=1)
    return logp, (h_new[None], c_new[None]), attn[:, None, :]


def reference_decode(params, token_seq, h0, c0, encoder_outputs, src_len=None):
    hidden = (h0, c0)
    logps, attns = [], []
    for t in range(token_seq.shape[0]):
        logp, hidden, attn = reference_forward(
            params, token_seq[t], hidden[0], hidden[1], encoder_outputs, src_len)
        logps.append(logp)
        attns.append(attn[:, 0, :])
    return jnp.stack(logps), hidden, jnp.stack(attns)


# ----------------------------- parameter init --------------------------------
def init_params(key, vocab_size, embedding_size, hidden_size):
    E, H, V = embedding_size, hidden_size, vocab_size
    ks = jax.random.split(key, 14)

    def w(k, shape, scale):
        return jax.random.normal(k, shape, jnp.float32) * scale

    sH = 1.0 / math.sqrt(H)
    sEH = 1.0 / math.sqrt(E + H)
    emb = w(ks[0], (V, E), 0.1).at[PAD_TOKEN].set(0.0)   # padding_idx=0 -> zero row
    return dict(
        embedding=emb,
        # Attn (Bahdanau): W, U linear layers and v vector
        W_w=w(ks[1], (H, H), sH), W_b=w(ks[2], (H,), sH),
        U_w=w(ks[3], (H, H), sH), U_b=w(ks[4], (H,), sH),
        v=w(ks[5], (1, H), 1.0),
        # LSTM(input=E+H, hidden=H), gate order i,f,g,o
        lstm_wih=w(ks[6], (4 * H, E + H), sEH), lstm_bih=w(ks[7], (4 * H,), sEH),
        lstm_whh=w(ks[8], (4 * H, H), sH), lstm_bhh=w(ks[9], (4 * H,), sH),
        # output projection
        out_w=w(ks[10], (V, H), sH), out_b=w(ks[11], (V,), sH),
    )


if __name__ == "__main__":
    B, L, T = 8, 12, 4      # batch (fills the 8 sublanes), src length, decode steps
    E, H, V = 32, 64, 100   # embedding, hidden, vocab (output_size)

    root = jax.random.PRNGKey(0)
    kp, k1, k2, k3, k4 = jax.random.split(root, 5)
    params = init_params(kp, V, E, H)
    token_seq = jax.random.randint(k1, (T, B), 1, V, dtype=jnp.int32)
    h0 = jax.random.normal(k2, (1, B, H), jnp.float32)
    c0 = jax.random.normal(k3, (1, B, H), jnp.float32)
    encoder_outputs = jax.random.normal(k4, (L, B, H), jnp.float32)
    src_len = jnp.array([12, 10, 12, 8, 12, 11, 7, 12], jnp.int32)

    # --- single-step forward: the module's forward() semantics ---------------
    logp, (h1, c1), attn_w = decoder_forward(
        params, token_seq[0], h0, c0, encoder_outputs, src_len)
    jax.block_until_ready((logp, h1, c1, attn_w))
    r_logp, (rh1, rc1), r_attn = reference_forward(
        params, token_seq[0], h0, c0, encoder_outputs, src_len)

    tol = dict(atol=2e-4, rtol=1e-3)   # exact softmax reciprocal -> tight tol
    assert logp.shape == (B, V) and attn_w.shape == (B, 1, L)
    assert h1.shape == (1, B, H) and c1.shape == (1, B, H)
    assert jnp.allclose(logp, r_logp, **tol)
    assert jnp.allclose(h1, rh1, **tol)
    assert jnp.allclose(c1, rc1, **tol)
    assert jnp.allclose(attn_w, r_attn, **tol)

    # --- fused multi-step decode: one pallas_call, grid over time ------------
    logps, (hT, cT), attns = decoder_decode(
        params, token_seq, h0, c0, encoder_outputs, src_len)
    jax.block_until_ready((logps, hT, cT, attns))
    r_logps, (rhT, rcT), r_attns = reference_decode(
        params, token_seq, h0, c0, encoder_outputs, src_len)

    tol_ms = dict(atol=5e-4, rtol=1e-3)   # tiny compounding over T recurrent steps
    assert logps.shape == (T, B, V) and attns.shape == (T, B, L)
    assert hT.shape == (1, B, H) and cT.shape == (1, B, H)
    assert jnp.allclose(logps, r_logps, **tol_ms)
    assert jnp.allclose(hT, rhT, **tol_ms)
    assert jnp.allclose(cT, rcT, **tol_ms)
    assert jnp.allclose(attns, r_attns, **tol_ms)

    print("KERNEL_OK")
</pallas_src>

<mosaic_0001>
module attributes {stable_mosaic.version = 11 : i64} {
  func.func @_decode_step_kernel(%arg0: i32, %arg1: memref<1x8x256xf32, #tpu.memory_space<vmem>>, %arg2: memref<8x64xf32, #tpu.memory_space<vmem>>, %arg3: memref<8x64xf32, #tpu.memory_space<vmem>>, %arg4: memref<8x16x64xf32, #tpu.memory_space<vmem>>, %arg5: memref<8x16x64xf32, #tpu.memory_space<vmem>>, %arg6: memref<8x16xf32, #tpu.memory_space<vmem>>, %arg7: memref<64x320xf32, #tpu.memory_space<vmem>>, %arg8: memref<64x256xf32, #tpu.memory_space<vmem>>, %arg9: memref<64x128xf32, #tpu.memory_space<vmem>>, %arg10: memref<1x64xf32, #tpu.memory_space<vmem>>, %arg11: memref<1x128xf32, #tpu.memory_space<vmem>>, %arg12: memref<1x8x128xf32, #tpu.memory_space<vmem>>, %arg13: memref<1x8x16xf32, #tpu.memory_space<vmem>>, %arg14: memref<8x64xf32, #tpu.memory_space<vmem>>, %arg15: memref<8x64xf32, #tpu.memory_space<vmem>>, %arg16: memref<8x64xf32, #tpu.memory_space<vmem>>, %arg17: memref<8x64xf32, #tpu.memory_space<vmem>>) attributes {dimension_semantics = [#tpu.dimension_semantics<arbitrary>], iteration_bounds = array<i64: 1>, scalar_prefetch = 0 : i64, scratch_operands = 2 : i64, tpu.core_type = #tpu.core_type<tc>, window_params = [{transform_indices = @transform_0, window_bounds = array<i64: 1, 8, 256>}, {pipeline_mode = #tpu.pipeline_mode<synchronous>, transform_indices = @transform_1, window_bounds = array<i64: 8, 64>}, {pipeline_mode = #tpu.pipeline_mode<synchronous>, transform_indices = @transform_2, window_bounds = array<i64: 8, 64>}, {pipeline_mode = #tpu.pipeline_mode<synchronous>, transform_indices = @transform_3, window_bounds = array<i64: 8, 16, 64>}, {pipeline_mode = #tpu.pipeline_mode<synchronous>, transform_indices = @transform_4, window_bounds = array<i64: 8, 16, 64>}, {pipeline_mode = #tpu.pipeline_mode<synchronous>, transform_indices = @transform_5, window_bounds = array<i64: 8, 16>}, {pipeline_mode = #tpu.pipeline_mode<synchronous>, transform_indices = @transform_6, window_bounds = array<i64: 64, 320>}, {pipeline_mode = #tpu.pipeline_mode<synchronous>, transform_indices = @transform_7, window_bounds = array<i64: 64, 256>}, {pipeline_mode = #tpu.pipeline_mode<synchronous>, transform_indices = @transform_8, window_bounds = array<i64: 64, 128>}, {pipeline_mode = #tpu.pipeline_mode<synchronous>, transform_indices = @transform_9, window_bounds = array<i64: 1, 64>}, {pipeline_mode = #tpu.pipeline_mode<synchronous>, transform_indices = @transform_10, window_bounds = array<i64: 1, 128>}, {transform_indices = @transform_11, window_bounds = array<i64: 1, 8, 128>}, {transform_indices = @transform_12, window_bounds = array<i64: 1, 8, 16>}, {pipeline_mode = #tpu.pipeline_mode<synchronous>, transform_indices = @transform_13, window_bounds = array<i64: 8, 64>}, {pipeline_mode = #tpu.pipeline_mode<synchronous>, transform_indices = @transform_14, window_bounds = array<i64: 8, 64>}]} {
    %c0 = arith.constant 0 : index
    %c0_0 = arith.constant 0 : index
    %c0_1 = arith.constant 0 : index
    %0 = vector.load %arg4[%c0, %c0_0, %c0_1] : memref<8x16x64xf32, #tpu.memory_space<vmem>>, vector<8x16x64xf32>
    %c0_i32 = arith.constant 0 : i32
    %1 = arith.cmpi eq, %arg0, %c0_i32 : i32
    %2 = arith.extui %1 : i1 to i32
    %c0_i32_2 = arith.constant 0 : i32
    %3 = arith.cmpi ne, %2, %c0_i32_2 : i32
    scf.if %3 {
      %c0_50 = arith.constant 0 : index
      %c0_51 = arith.constant 0 : index
      %92 = vector.load %arg2[%c0_50, %c0_51] : memref<8x64xf32, #tpu.memory_space<vmem>>, vector<8x64xf32>
      %c0_52 = arith.constant 0 : index
      %c0_53 = arith.constant 0 : index
      %93 = vector.load %arg16[%c0_52, %c0_53] : memref<8x64xf32, #tpu.memory_space<vmem>>, vector<8x64xf32>
      tpu.vector_store %arg16[%c0_52, %c0_53], %92 {strides = array<i32>} : memref<8x64xf32, #tpu.memory_space<vmem>>, vector<8x64xf32>,
      %c0_54 = arith.constant 0 : index
      %c0_55 = arith.constant 0 : index
      %94 = vector.load %arg3[%c0_54, %c0_55] : memref<8x64xf32, #tpu.memory_space<vmem>>, vector<8x64xf32>
      %c0_56 = arith.constant 0 : index
      %c0_57 = arith.constant 0 : index
      %95 = vector.load %arg17[%c0_56, %c0_57] : memref<8x64xf32, #tpu.memory_space<vmem>>, vector<8x64xf32>
      tpu.vector_store %arg17[%c0_56, %c0_57], %94 {strides = array<i32>} : memref<8x64xf32, #tpu.memory_space<vmem>>, vector<8x64xf32>,
    } else {
    }
    %c0_3 = arith.constant 0 : index
    %c0_4 = arith.constant 0 : index
    %4 = vector.load %arg16[%c0_3, %c0_4] : memref<8x64xf32, #tpu.memory_space<vmem>>, vector<8x64xf32>
    %c0_5 = arith.constant 0 : index
    %c0_6 = arith.constant 0 : index
    %5 = vector.load %arg17[%c0_5, %c0_6] : memref<8x64xf32, #tpu.memory_space<vmem>>, vector<8x64xf32>
    %c0_7 = arith.constant 0 : index
    %c0_8 = arith.constant 0 : index
    %6 = vector.load %arg7[%c0_7, %c0_8] : memref<64x320xf32, #tpu.memory_space<vmem>>, vector<64x320xf32>
    %cst = arith.constant dense<0.000000e+00> : vector<8x320xf32>
    %7 = tpu.matmul %4, %6, %cst {dimension_numbers = #tpu.dot_dimension_numbers<[1], [0], [0], [1], [0, 0, 1, 1], [], []>, precision = #tpu.contract_precision<fp32>} : vector<8x64xf32>, vector<64x320xf32>, vector<8x320xf32> -> vector<8x320xf32>
    %8 = vector.extract_strided_slice %7 {offsets = [0, 0], sizes = [8, 256], strides = [1, 1]} : vector<8x320xf32> to vector<8x256xf32>
    %9 = vector.extract_strided_slice %7 {offsets = [0, 256], sizes = [8, 64], strides = [1, 1]} : vector<8x320xf32> to vector<8x64xf32>
    %10 = vector.shape_cast %9 : vector<8x64xf32> to vector<8x1x64xf32>
    %c0_9 = arith.constant 0 : index
    %c0_10 = arith.constant 0 : index
    %c0_11 = arith.constant 0 : index
    %11 = vector.load %arg5[%c0_9, %c0_10, %c0_11] : memref<8x16x64xf32, #tpu.memory_space<vmem>>, vector<8x16x64xf32>
    %12 = vector.broadcast %10 : vector<8x1x64xf32> to vector<8x16x64xf32>
    %13 = arith.addf %12, %11 : vector<8x16x64xf32>
    %14 = math.tanh %13 : vector<8x16x64xf32>
    %c0_12 = arith.constant 0 : index
    %c0_13 = arith.constant 0 : index
    %15 = vector.load %arg10[%c0_12, %c0_13] : memref<1x64xf32, #tpu.memory_space<vmem>>, vector<1x64xf32>
    %16 = vector.shape_cast %15 : vector<1x64xf32> to vector<1x1x64xf32>
    %17 = vector.broadcast %16 : vector<1x1x64xf32> to vector<8x16x64xf32>
    %18 = arith.mulf %14, %17 : vector<8x16x64xf32>
    %cst_14 = arith.constant dense<0.000000e+00> : vector<8x16xf32>
    %19 = vector.multi_reduction <add>, %18, %cst_14 [2] : vector<8x16x64xf32> to vector<8x16xf32>
    %c0_15 = arith.constant 0 : index
    %c0_16 = arith.constant 0 : index
    %20 = vector.load %arg6[%c0_15, %c0_16] : memref<8x16xf32, #tpu.memory_space<vmem>>, vector<8x16xf32>
    %21 = arith.addf %19, %20 : vector<8x16xf32>
    %cst_17 = arith.constant dense<0xFF800000> : vector<8xf32>
    %22 = vector.multi_reduction <maximumf>, %21, %cst_17 [1] : vector<8x16xf32> to vector<8xf32>
    %23 = vector.shape_cast %22 : vector<8xf32> to vector<8x1xf32>
    %24 = vector.broadcast %23 : vector<8x1xf32> to vector<8x16xf32>
    %25 = arith.subf %21, %24 : vector<8x16xf32>
    %26 = math.exp %25 : vector<8x16xf32>
    %cst_18 = arith.constant dense<0.000000e+00> : vector<8xf32>
    %27 = vector.multi_reduction <add>, %26, %cst_18 [1] : vector<8x16xf32> to vector<8xf32>
    %28 = vector.shape_cast %27 : vector<8xf32> to vector<8x1xf32>
    %29 = vector.broadcast %28 : vector<8x1xf32> to vector<8x16xf32>
    %30 = arith.divf %26, %29 : vector<8x16xf32>
    %c0_19 = arith.constant 0 : index
    %c0_20 = arith.constant 0 : index
    %c0_21 = arith.constant 0 : index
    %31 = vector.load %arg13[%c0_19, %c0_20, %c0_21] : memref<1x8x16xf32, #tpu.memory_space<vmem>>, vector<1x8x16xf32>
    %32 = vector.shape_cast %31 : vector<1x8x16xf32> to vector<8x16xf32>
    %33 = vector.shape_cast %30 : vector<8x16xf32> to vector<1x8x16xf32>
    tpu.vector_store %arg13[%c0_19, %c0_20, %c0_21], %33 {strides = array<i32>} : memref<1x8x16xf32, #tpu.memory_space<vmem>>, vector<1x8x16xf32>,
    %34 = vector.shape_cast %30 : vector<8x16xf32> to vector<8x16x1xf32>
    %35 = vector.broadcast %34 : vector<8x16x1xf32> to vector<8x16x64xf32>
    %36 = arith.mulf %35, %0 : vector<8x16x64xf32>
    %cst_22 = arith.constant dense<0.000000e+00> : vector<8x64xf32>
    %37 = vector.multi_reduction <add>, %36, %cst_22 [1] : vector<8x16x64xf32> to vector<8x64xf32>
    %c0_23 = arith.constant 0 : index
    %c0_24 = arith.constant 0 : index
    %c0_25 = arith.constant 0 : index
    %38 = vector.load %arg1[%c0_23, %c0_24, %c0_25] : memref<1x8x256xf32, #tpu.memory_space<vmem>>, vector<1x8x256xf32>
    %39 = vector.shape_cast %38 : vector<1x8x256xf32> to vector<8x256xf32>
    %40 = arith.addf %39, %8 : vector<8x256xf32>
    %c0_26 = arith.constant 0 : index
    %c0_27 = arith.constant 0 : index
    %41 = vector.load %arg8[%c0_26, %c0_27] : memref<64x256xf32, #tpu.memory_space<vmem>>, vector<64x256xf32>
    %cst_28 = arith.constant dense<0.000000e+00> : vector<8x256xf32>
    %42 = tpu.matmul %37, %41, %cst_28 {dimension_numbers = #tpu.dot_dimension_numbers<[1], [0], [0], [1], [0, 0, 1, 1], [], []>, precision = #tpu.contract_precision<fp32>} : vector<8x64xf32>, vector<64x256xf32>, vector<8x256xf32> -> vector<8x256xf32>
    %43 = arith.addf %40, %42 : vector<8x256xf32>
    %44 = vector.extract_strided_slice %43 {offsets = [0, 0], sizes = [8, 64], strides = [1, 1]} : vector<8x256xf32> to vector<8x64xf32>
    %45 = arith.negf %44 : vector<8x64xf32>
    %46 = math.exp %45 : vector<8x64xf32>
    %cst_29 = arith.constant 1.000000e+00 : f32
    %47 = vector.broadcast %cst_29 : f32 to vector<8x64xf32>
    %48 = arith.addf %47, %46 : vector<8x64xf32>
    %49 = arith.divf %47, %48 : vector<8x64xf32>
    %50 = vector.extract_strided_slice %43 {offsets = [0, 64], sizes = [8, 64], strides = [1, 1]} : vector<8x256xf32> to vector<8x64xf32>
    %51 = arith.negf %50 : vector<8x64xf32>
    %52 = math.exp %51 : vector<8x64xf32>
    %cst_30 = arith.constant 1.000000e+00 : f32
    %53 = vector.broadcast %cst_30 : f32 to vector<8x64xf32>
    %54 = arith.addf %53, %52 : vector<8x64xf32>
    %55 = arith.divf %53, %54 : vector<8x64xf32>
    %56 = vector.extract_strided_slice %43 {offsets = [0, 128], sizes = [8, 64], strides = [1, 1]} : vector<8x256xf32> to vector<8x64xf32>
    %57 = math.tanh %56 : vector<8x64xf32>
    %58 = vector.extract_strided_slice %43 {offsets = [0, 192], sizes = [8, 64], strides = [1, 1]} : vector<8x256xf32> to vector<8x64xf32>
    %59 = arith.negf %58 : vector<8x64xf32>
    %60 = math.exp %59 : vector<8x64xf32>
    %cst_31 = arith.constant 1.000000e+00 : f32
    %61 = vector.broadcast %cst_31 : f32 to vector<8x64xf32>
    %62 = arith.addf %61, %60 : vector<8x64xf32>
    %63 = arith.divf %61, %62 : vector<8x64xf32>
    %64 = arith.mulf %55, %5 : vector<8x64xf32>
    %65 = arith.mulf %49, %57 : vector<8x64xf32>
    %66 = arith.addf %64, %65 : vector<8x64xf32>
    %67 = math.tanh %66 : vector<8x64xf32>
    %68 = arith.mulf %63, %67 : vector<8x64xf32>
    %c0_32 = arith.constant 0 : index
    %c0_33 = arith.constant 0 : index
    %69 = vector.load %arg16[%c0_32, %c0_33] : memref<8x64xf32, #tpu.memory_space<vmem>>, vector<8x64xf32>
    tpu.vector_store %arg16[%c0_32, %c0_33], %68 {strides = array<i32>} : memref<8x64xf32, #tpu.memory_space<vmem>>, vector<8x64xf32>,
    %c0_34 = arith.constant 0 : index
    %c0_35 = arith.constant 0 : index
    %70 = vector.load %arg17[%c0_34, %c0_35] : memref<8x64xf32, #tpu.memory_space<vmem>>, vector<8x64xf32>
    tpu.vector_store %arg17[%c0_34, %c0_35], %66 {strides = array<i32>} : memref<8x64xf32, #tpu.memory_space<vmem>>, vector<8x64xf32>,
    %c0_36 = arith.constant 0 : index
    %c0_37 = arith.constant 0 : index
    %71 = vector.load %arg14[%c0_36, %c0_37] : memref<8x64xf32, #tpu.memory_space<vmem>>, vector<8x64xf32>
    tpu.vector_store %arg14[%c0_36, %c0_37], %68 {strides = array<i32>} : memref<8x64xf32, #tpu.memory_space<vmem>>, vector<8x64xf32>,
    %c0_38 = arith.constant 0 : index
    %c0_39 = arith.constant 0 : index
    %72 = vector.load %arg15[%c0_38, %c0_39] : memref<8x64xf32, #tpu.memory_space<vmem>>, vector<8x64xf32>
    tpu.vector_store %arg15[%c0_38, %c0_39], %66 {strides = array<i32>} : memref<8x64xf32, #tpu.memory_space<vmem>>, vector<8x64xf32>,
    %c0_40 = arith.constant 0 : index
    %c0_41 = arith.constant 0 : index
    %73 = vector.load %arg9[%c0_40, %c0_41] : memref<64x128xf32, #tpu.memory_space<vmem>>, vector<64x128xf32>
    %cst_42 = arith.constant dense<0.000000e+00> : vector<8x128xf32>
    %74 = tpu.matmul %68, %73, %cst_42 {dimension_numbers = #tpu.dot_dimension_numbers<[1], [0], [0], [1], [0, 0, 1, 1], [], []>, precision = #tpu.contract_precision<fp32>} : vector<8x64xf32>, vector<64x128xf32>, vector<8x128xf32> -> vector<8x128xf32>
    %c0_43 = arith.constant 0 : index
    %c0_44 = arith.constant 0 : index
    %75 = vector.load %arg11[%c0_43, %c0_44] : memref<1x128xf32, #tpu.memory_space<vmem>>, vector<1x128xf32>
    %76 = vector.broadcast %75 : vector<1x128xf32> to vector<8x128xf32>
    %77 = arith.addf %74, %76 : vector<8x128xf32>
    %cst_45 = arith.constant dense<0xFF800000> : vector<8xf32>
    %78 = vector.multi_reduction <maximumf>, %77, %cst_45 [1] : vector<8x128xf32> to vector<8xf32>
    %79 = vector.shape_cast %78 : vector<8xf32> to vector<8x1xf32>
    %80 = vector.broadcast %79 : vector<8x1xf32> to vector<8x128xf32>
    %81 = arith.subf %77, %80 : vector<8x128xf32>
    %82 = math.exp %81 : vector<8x128xf32>
    %cst_46 = arith.constant dense<0.000000e+00> : vector<8xf32>
    %83 = vector.multi_reduction <add>, %82, %cst_46 [1] : vector<8x128xf32> to vector<8xf32>
    %84 = vector.shape_cast %83 : vector<8xf32> to vector<8x1xf32>
    %85 = math.log %84 : vector<8x1xf32>
    %86 = arith.addf %85, %79 : vector<8x1xf32>
    %87 = vector.broadcast %86 : vector<8x1xf32> to vector<8x128xf32>
    %88 = arith.subf %77, %87 : vector<8x128xf32>
    %c0_47 = arith.constant 0 : index
    %c0_48 = arith.constant 0 : index
    %c0_49 = arith.constant 0 : index
    %89 = vector.load %arg12[%c0_47, %c0_48, %c0_49] : memref<1x8x128xf32, #tpu.memory_space<vmem>>, vector<1x8x128xf32>
    %90 = vector.shape_cast %89 : vector<1x8x128xf32> to vector<8x128xf32>
    %91 = vector.shape_cast %88 : vector<8x128xf32> to vector<1x8x128xf32>
    tpu.vector_store %arg12[%c0_47, %c0_48, %c0_49], %91 {strides = array<i32>} : memref<1x8x128xf32, #tpu.memory_space<vmem>>, vector<1x8x128xf32>,
    return
  }
  func.func @transform_0(%arg0: i32) -> (i32, i32, i32) {
    %c0_i32 = arith.constant 0 : i32
    %c0_i32_0 = arith.constant 0 : i32
    %c0_i32_1 = arith.constant 0 : i32
    return %arg0, %c0_i32, %c0_i32_0 : i32, i32, i32
  }
  func.func @transform_1(%arg0: i32) -> (i32, i32) {
    %c0_i32 = arith.constant 0 : i32
    %c0_i32_0 = arith.constant 0 : i32
    %c0_i32_1 = arith.constant 0 : i32
    return %c0_i32, %c0_i32_0 : i32, i32
  }
  func.func @transform_2(%arg0: i32) -> (i32, i32) {
    %c0_i32 = arith.constant 0 : i32
    %c0_i32_0 = arith.constant 0 : i32
    %c0_i32_1 = arith.constant 0 : i32
    return %c0_i32, %c0_i32_0 : i32, i32
  }
  func.func @transform_3(%arg0: i32) -> (i32, i32, i32) {
    %c0_i32 = arith.constant 0 : i32
    %c0_i32_0 = arith.constant 0 : i32
    %c0_i32_1 = arith.constant 0 : i32
    %c0_i32_2 = arith.constant 0 : i32
    return %c0_i32, %c0_i32_0, %c0_i32_1 : i32, i32, i32
  }
  func.func @transform_4(%arg0: i32) -> (i32, i32, i32) {
    %c0_i32 = arith.constant 0 : i32
    %c0_i32_0 = arith.constant 0 : i32
    %c0_i32_1 = arith.constant 0 : i32
    %c0_i32_2 = arith.constant 0 : i32
    return %c0_i32, %c0_i32_0, %c0_i32_1 : i32, i32, i32
  }
  func.func @transform_5(%arg0: i32) -> (i32, i32) {
    %c0_i32 = arith.constant 0 : i32
    %c0_i32_0 = arith.constant 0 : i32
    %c0_i32_1 = arith.constant 0 : i32
    return %c0_i32, %c0_i32_0 : i32, i32
  }
  func.func @transform_6(%arg0: i32) -> (i32, i32) {
    %c0_i32 = arith.constant 0 : i32
    %c0_i32_0 = arith.constant 0 : i32
    %c0_i32_1 = arith.constant 0 : i32
    return %c0_i32, %c0_i32_0 : i32, i32
  }
  func.func @transform_7(%arg0: i32) -> (i32, i32) {
    %c0_i32 = arith.constant 0 : i32
    %c0_i32_0 = arith.constant 0 : i32
    %c0_i32_1 = arith.constant 0 : i32
    return %c0_i32, %c0_i32_0 : i32, i32
  }
  func.func @transform_8(%arg0: i32) -> (i32, i32) {
    %c0_i32 = arith.constant 0 : i32
    %c0_i32_0 = arith.constant 0 : i32
    %c0_i32_1 = arith.constant 0 : i32
    return %c0_i32, %c0_i32_0 : i32, i32
  }
  func.func @transform_9(%arg0: i32) -> (i32, i32) {
    %c0_i32 = arith.constant 0 : i32
    %c0_i32_0 = arith.constant 0 : i32
    %c0_i32_1 = arith.constant 0 : i32
    return %c0_i32, %c0_i32_0 : i32, i32
  }
  func.func @transform_10(%arg0: i32) -> (i32, i32) {
    %c0_i32 = arith.constant 0 : i32
    %c0_i32_0 = arith.constant 0 : i32
    %c0_i32_1 = arith.constant 0 : i32
    return %c0_i32, %c0_i32_0 : i32, i32
  }
  func.func @transform_11(%arg0: i32) -> (i32, i32, i32) {
    %c0_i32 = arith.constant 0 : i32
    %c0_i32_0 = arith.constant 0 : i32
    %c0_i32_1 = arith.constant 0 : i32
    return %arg0, %c0_i32, %c0_i32_0 : i32, i32, i32
  }
  func.func @transform_12(%arg0: i32) -> (i32, i32, i32) {
    %c0_i32 = arith.constant 0 : i32
    %c0_i32_0 = arith.constant 0 : i32
    %c0_i32_1 = arith.constant 0 : i32
    return %arg0, %c0_i32, %c0_i32_0 : i32, i32, i32
  }
  func.func @transform_13(%arg0: i32) -> (i32, i32) {
    %c0_i32 = arith.constant 0 : i32
    %c0_i32_0 = arith.constant 0 : i32
    %c0_i32_1 = arith.constant 0 : i32
    return %c0_i32, %c0_i32_0 : i32, i32
  }
  func.func @transform_14(%arg0: i32) -> (i32, i32) {
    %c0_i32 = arith.constant 0 : i32
    %c0_i32_0 = arith.constant 0 : i32
    %c0_i32_1 = arith.constant 0 : i32
    return %c0_i32, %c0_i32_0 : i32, i32
  }
}

</mosaic_0001>

<bundles_post_ra>
// kernel: tpu_custom_call.1
= control target key start
LH: loop header
LB: loop body
LE: loop exit
PB: predicated region body
PF: predicated region fallthrough
CT: control target
= control target key end

     0   :  { %20 = vsyncpa [#allocation5], 0  ;;  %s6279_s0 = inlined_call_operand.hbm [shape: f32[1,8,256], index: 0, kind: input, shape index: {}]   ;;  %s6280_s1 = inlined_call_operand.hbm [shape: f32[8,64], index: 1, kind: input, shape index: {}]   ;;  %s6281_s2 = inlined_call_operand.hbm [shape: f32[8,64], index: 2, kind: input, shape index: {}]   ;;  %s6282_s3 = inlined_call_operand.hbm [shape: f32[8,16,64], index: 3, kind: input, shape index: {}]   ;;  %s6283_s4 = inlined_call_operand.hbm [shape: f32[8,16,64], index: 4, kind: input, shape index: {}]   ;;  %s6284_s5 = inlined_call_operand.vmem [shape: f32[8,16], index: 5, kind: input, shape index: {}]   ;;  %s6285_s6 = inlined_call_operand.hbm [shape: f32[64,320], index: 6, kind: input, shape index: {}]   ;;  %s6286_s7 = inlined_call_operand.hbm [shape: f32[64,256], index: 7, kind: input, shape index: {}]   ;;  %s6287_s8 = inlined_call_operand.hbm [shape: f32[64,128], index: 8, kind: input, shape index: {}]   ;;  %s6288_s9 = inlined_call_operand.vmem [shape: f32[1,64], index: 9, kind: input, shape index: {}]   ;;  %s6289_s10 = inlined_call_operand.vmem [shape: f32[1,128], index: 10, kind: input, shape index: {}]   ;;  %s6290_s11 = inlined_call_operand.hbm [shape: f32[1,8,128], index: 11, kind: output, shape index: {0}]   ;;  %s6291_s12 = inlined_call_operand.hbm [shape: f32[1,8,16], index: 12, kind: output, shape index: {1}]   ;;  %s6292_s13 = inlined_call_operand.hbm [shape: f32[8,64], index: 13, kind: output, shape index: {2}]   ;;  %s6293_s14 = inlined_call_operand.hbm [shape: f32[8,64], index: 14, kind: output, shape index: {3}]  }
   0x1   :  { %21 = vsyncpa [#allocation8], 0 }
   0x2   :  { %22 = vsyncpa [#allocation11], 0 }
   0x3   :  { %23 = vsyncpa [#allocation14], 0 }
   0x4   :  { %24 = vsyncpa [#allocation17], 0 }
   0x5   :  { %25 = vsyncpa [#allocation6], 0 }
   0x6   :  { %26 = vsyncpa [#allocation20], 0 }
   0x7   :  { %27 = vsyncpa [#allocation23], 0  ;;  %s4900_s29 = smov [#allocation7]   ;;  %s4901_s15 = smov [#allocation10]  }
   0x8   :  { %s44_s30 = sshll.u32 %s4900_s29, 4  ;;  %s63_s16 = sshll.u32 %s4901_s15, 4  ;;  %s45_s30 = int_to_ptr.vmem [resolvable:$true] %s44_s30  ;;  %s4999_s16 = int_to_ptr.vmem [resolvable:$true] %s63_s16 }
   0x9   :  { %s4620_s19 = scalar_lea.hbm %s6280_s1, 128 }
   0xa   :  { %p4621_p0 = scmp.ne.s32.totalorder %s6280_s1, %s4620_s19  ;;  %p4624_p1 = scmp.lt.u32.totalorder %s4620_s19, %s6280_s1 }
   0xc   :  { %p4626_p2 = pnand %p4624_p1, %p4621_p0 }
   0xe   :  { %4629 = shalt.err (!%p4626_p2)
}
   0xf   :  { %s4630_s24 = scalar_lea.vmem %s45_s30, 128  ;;  %p4635_p4 = scmp.lt.s32.totalorder %s45_s30, %s45_s30 }
  0x10   :  { %p4631_p3 = scmp.ne.s32.totalorder %s45_s30, %s4630_s24  ;;  %p4636_p5 = scmp.lt.s32.totalorder %s4630_s24, %s4630_s24 }
  0x12   :  { %p4637_p6 = por %p4636_p5, %p4635_p4 }
  0x14   :  { %p4638_p7 = pnand %p4637_p6, %p4631_p3 }
  0x16   :  { %4641 = shalt.err (!%p4638_p7)
}
  0x17   :  { %47 = dma.hbm_to_vmem [thread:$0]  %s6280_s1, 128, %s45_s30, [#allocation8]  }
  0x18   :  { %s4642_s29 = scalar_lea.hbm %s6282_s3, 2048 }
  0x19   :  { %p4643_p8 = scmp.ne.s32.totalorder %s6282_s3, %s4642_s29  ;;  %p4646_p9 = scmp.lt.u32.totalorder %s4642_s29, %s6282_s3 }
  0x1b   :  { %p4648_p10 = pnand %p4646_p9, %p4643_p8 }
  0x1d   :  { %4651 = shalt.err (!%p4648_p10)
}
  0x1e   :  { %s4652_s20 = scalar_lea.vmem %s4999_s16, 2048  ;;  %p4657_p12 = scmp.lt.s32.totalorder %s4999_s16, %s4999_s16 }
  0x1f   :  { %p4653_p11 = scmp.ne.s32.totalorder %s4999_s16, %s4652_s20  ;;  %p4658_p13 = scmp.lt.s32.totalorder %s4652_s20, %s4652_s20 }
  0x21   :  { %p4659_p0 = por %p4658_p13, %p4657_p12 }
  0x23   :  { %p4660_p1 = pnand %p4659_p0, %p4653_p11 }
  0x25   :  { %4663 = shalt.err (!%p4660_p1)
}
  0x26   :  { %s4902_s1 = smov 128   ;;  %s4903_s30 = smov 8  }
  0x27   :  { %69 = dma.hbm_to_vmem [thread:$0]  %s6282_s3, 2048, %s4999_s16, [#allocation11], %s4902_s1, %s4902_s1, %s4903_s30  }
  0x28   :  { %s4904_s23 = smov [#allocation13]   ;;  %s4664_s27 = scalar_lea.hbm %s6285_s6, 3072 }
  0x29   :  { %s89_s24 = sshll.u32 %s4904_s23, 4  ;;  %p4665_p2 = scmp.ne.s32.totalorder %s6285_s6, %s4664_s27  ;;  %s90_s24 = int_to_ptr.vmem [resolvable:$true] %s89_s24 }
  0x2a   :  { %p4668_p3 = scmp.lt.u32.totalorder %s4664_s27, %s6285_s6 }
  0x2c   :  { %p4670_p4 = pnand %p4668_p3, %p4665_p2 }
  0x2e   :  { %4673 = shalt.err (!%p4670_p4)
}
  0x2f   :  { %s4674_s18 = scalar_lea.vmem %s90_s24, 3072  ;;  %p4679_p6 = scmp.lt.s32.totalorder %s90_s24, %s90_s24 }
  0x30   :  { %p4675_p5 = scmp.ne.s32.totalorder %s90_s24, %s4674_s18  ;;  %p4680_p7 = scmp.lt.s32.totalorder %s4674_s18, %s4674_s18 }
  0x32   :  { %p4681_p8 = por %p4680_p7, %p4679_p6 }
  0x34   :  { %p4682_p9 = pnand %p4681_p8, %p4675_p5 }
  0x36   :  { %4685 = shalt.err (!%p4682_p9)
}
  0x37   :  { %s4905_s3 = smov 384   ;;  %s4906_s16 = smov 24  }
  0x38   :  { %95 = dma.hbm_to_vmem [thread:$0]  %s6285_s6, 3072, %s90_s24, [#allocation14], %s4905_s3, %s4905_s3, %s4906_s16  }
  0x39   :  { %s4907_s21 = smov [#allocation4]   ;;  %s4908_s23 = smov [#allocation9]  }
  0x3a   :  { %s34_s22 = sshll.u32 %s4907_s21, 4  ;;  %s54_s25 = sshll.u32 %s4908_s23, 4  ;;  %s35_s22 = int_to_ptr.vmem [resolvable:$true] %s34_s22  ;;  %s55_s25 = int_to_ptr.vmem [resolvable:$true] %s54_s25 }
  0x3b   :  { %s4686_s28 = scalar_lea.hbm %s6279_s0, 256 }
  0x3c   :  { %p4687_p10 = scmp.ne.s32.totalorder %s6279_s0, %s4686_s28  ;;  %p4690_p11 = scmp.lt.u32.totalorder %s4686_s28, %s6279_s0 }
  0x3e   :  { %p4692_p12 = pnand %p4690_p11, %p4687_p10 }
  0x40   :  { %4695 = shalt.err (!%p4692_p12)
}
  0x41   :  { %s4696_s6 = scalar_lea.vmem %s35_s22, 256  ;;  %p4701_p0 = scmp.lt.s32.totalorder %s35_s22, %s35_s22 }
  0x42   :  { %p4697_p13 = scmp.ne.s32.totalorder %s35_s22, %s4696_s6  ;;  %p4702_p1 = scmp.lt.s32.totalorder %s4696_s6, %s4696_s6 }
  0x44   :  { %p4703_p2 = por %p4702_p1, %p4701_p0 }
  0x46   :  { %p4704_p3 = pnand %p4703_p2, %p4697_p13 }
  0x48   :  { %4707 = shalt.err (!%p4704_p3)
}
  0x49   :  { %37 = dma.hbm_to_vmem [thread:$0]  %s6279_s0, 256, %s35_s22, [#allocation5]  }
  0x4a   :  { %s4708_s20 = scalar_lea.hbm %s6281_s2, 128 }
  0x4b   :  { %p4709_p4 = scmp.ne.s32.totalorder %s6281_s2, %s4708_s20  ;;  %p4712_p5 = scmp.lt.u32.totalorder %s4708_s20, %s6281_s2 }
  0x4d   :  { %p4714_p6 = pnand %p4712_p5, %p4709_p4 }
  0x4f   :  { %4717 = shalt.err (!%p4714_p6)
}
  0x50   :  { %s4718_s28 = scalar_lea.vmem %s55_s25, 128  ;;  %p4723_p8 = scmp.lt.s32.totalorder %s55_s25, %s55_s25 }
  0x51   :  { %p4719_p7 = scmp.ne.s32.totalorder %s55_s25, %s4718_s28  ;;  %p4724_p9 = scmp.lt.s32.totalorder %s4718_s28, %s4718_s28 }
  0x53   :  { %p4725_p10 = por %p4724_p9, %p4723_p8 }
  0x55   :  { %p4726_p11 = pnand %p4725_p10, %p4719_p7 }
  0x57   :  { %4729 = shalt.err (!%p4726_p11)
}
  0x58   :  { %57 = dma.hbm_to_vmem [thread:$0]  %s6281_s2, 128, %s55_s25, [#allocation8]  }
  0x59   :  { %s4909_s29 = smov [#allocation12]   ;;  %s4910_s17 = smov [#allocation15]  }
  0x5a   :  { %s75_s15 = sshll.u32 %s4909_s29, 4  ;;  %s101_s18 = sshll.u32 %s4910_s17, 4  ;;  %s76_s15 = int_to_ptr.vmem [resolvable:$true] %s75_s15  ;;  %s102_s18 = int_to_ptr.vmem [resolvable:$true] %s101_s18 }
  0x5b   :  { %s4730_s3 = scalar_lea.hbm %s6283_s4, 2048 }
  0x5c   :  { %p4731_p12 = scmp.ne.s32.totalorder %s6283_s4, %s4730_s3  ;;  %p4734_p13 = scmp.lt.u32.totalorder %s4730_s3, %s6283_s4 }
  0x5e   :  { %p4736_p0 = pnand %p4734_p13, %p4731_p12 }
  0x60   :  { %4739 = shalt.err (!%p4736_p0)
}
  0x61   :  { %s4740_s2 = scalar_lea.vmem %s76_s15, 2048  ;;  %p4745_p2 = scmp.lt.s32.totalorder %s76_s15, %s76_s15 }
  0x62   :  { %p4741_p1 = scmp.ne.s32.totalorder %s76_s15, %s4740_s2  ;;  %p4746_p3 = scmp.lt.s32.totalorder %s4740_s2, %s4740_s2 }
  0x64   :  { %p4747_p4 = por %p4746_p3, %p4745_p2 }
  0x66   :  { %p4748_p5 = pnand %p4747_p4, %p4741_p1 }
  0x68   :  { %4751 = shalt.err (!%p4748_p5)
}
  0x69   :  { %81 = dma.hbm_to_vmem [thread:$0]  %s6283_s4, 2048, %s76_s15, [#allocation11], %s4902_s1, %s4902_s1, %s4903_s30  }
  0x6a   :  { %s4752_s28 = scalar_lea.hbm %s6286_s7, 2048 }
  0x6b   :  { %p4753_p6 = scmp.ne.s32.totalorder %s6286_s7, %s4752_s28  ;;  %p4756_p7 = scmp.lt.u32.totalorder %s4752_s28, %s6286_s7 }
  0x6d   :  { %p4758_p8 = pnand %p4756_p7, %p4753_p6 }
  0x6f   :  { %4761 = shalt.err (!%p4758_p8)
}
  0x70   :  { %s4762_s6 = scalar_lea.vmem %s102_s18, 2048  ;;  %p4767_p10 = scmp.lt.s32.totalorder %s102_s18, %s102_s18 }
  0x71   :  { %p4763_p9 = scmp.ne.s32.totalorder %s102_s18, %s4762_s6  ;;  %p4768_p11 = scmp.lt.s32.totalorder %s4762_s6, %s4762_s6 }
  0x73   :  { %p4769_p12 = por %p4768_p11, %p4767_p10 }
  0x75   :  { %p4770_p13 = pnand %p4769_p12, %p4763_p9 }
  0x77   :  { %4773 = shalt.err (!%p4770_p13)
}
  0x78   :  { %s4911_s4 = smov 256   ;;  %s4912_s15 = smov 16  }
  0x79   :  { %107 = dma.hbm_to_vmem [thread:$0]  %s6286_s7, 2048, %s102_s18, [#allocation14], %s4911_s4, %s4911_s4, %s4912_s15  }
  0x7a   :  { %s4913_s16 = smov [#allocation16]   ;;  %s4774_s2 = scalar_lea.hbm %s6287_s8, 1024 }
  0x7b   :  { %s113_s19 = sshll.u32 %s4913_s16, 4  ;;  %p4775_p0 = scmp.ne.s32.totalorder %s6287_s8, %s4774_s2  ;;  %s114_s19 = int_to_ptr.vmem [resolvable:$true] %s113_s19 }
  0x7c   :  { %p4778_p1 = scmp.lt.u32.totalorder %s4774_s2, %s6287_s8 }
  0x7e   :  { %p4780_p2 = pnand %p4778_p1, %p4775_p0 }
  0x80   :  { %4783 = shalt.err (!%p4780_p2)
}
  0x81   :  { %s4784_s28 = scalar_lea.vmem %s114_s19, 1024  ;;  %p4789_p4 = scmp.lt.s32.totalorder %s114_s19, %s114_s19 }
  0x82   :  { %p4785_p3 = scmp.ne.s32.totalorder %s114_s19, %s4784_s28  ;;  %p4790_p5 = scmp.lt.s32.totalorder %s4784_s28, %s4784_s28 }
  0x84   :  { %p4791_p6 = por %p4790_p5, %p4789_p4 }
  0x86   :  { %p4792_p7 = pnand %p4791_p6, %p4785_p3 }
  0x88   :  { %4795 = shalt.err (!%p4792_p7)
}
  0x89   :  { %119 = dma.hbm_to_vmem [thread:$0]  %s6287_s8, 1024, %s114_s19, [#allocation17], %s4902_s1, %s4902_s1, %s4903_s30  }
  0x8a   :  { %4884 = dma.done.wait [#allocation5], 256  }
  0x8b   :  { %4885 = vsyncadd [#allocation5], 4294967040 }
  0x8c   :  { %4886 = dma.done.wait [#allocation8], 256  }
  0x8d   :  { %4887 = vsyncadd [#allocation8], 4294967040 }
  0x8e   :  { %4888 = dma.done.wait [#allocation11], 4096  }
  0x8f   :  { %4889 = vsyncadd [#allocation11], 4294963200 }
  0x90   :  { %4890 = dma.done.wait [#allocation14], 5120  }
  0x91   :  { %4891 = vsyncadd [#allocation14], 4294962176 }
  0x92   :  { %4892 = dma.done.wait [#allocation17], 1024  }
  0x93   :  { %4893 = vsyncadd [#allocation17], 4294966272  ;;  %v6294_v0 = vmov 0.0|0.0   ;;  %vm4915_vm0 = vmmov 0   ;;  %v6296_v1 = vmov 0.0   ;;  %v177_v2 = vld [vmem:[#allocation13 + $0x10] sm:$0xff]  ;;  %v1392_v16 = vlaneseq }
  0x94   :  { %4213 = vmatprep.subr.bf16.mxu1 %v6294_v0  ;;  %3905 = vmatprep.mubr.msk.f32.mxu1 %vm4915_vm0, %v6296_v1  ;;  %v180_v3 = vld [vmem:[#allocation13 + $0x28] sm:$0xff]  ;;  %v183_v4 = vld [vmem:[#allocation13 + $0x40] sm:$0xff]  ;;  %vm169_vm1 = vcmask 523264   ;;  %v851_v5 = vand.u32 4294901760, %v177_v2  ;;  %v186_v7 = vld [vmem:[#allocation13 + $0x58] sm:$0xff]  ;;  %vm1793_vm2 = vcmask 130112  }
  0x95   :  { %283 = vmatprep.mubr.f32.mxu0 %v6296_v1  ;;  %v854_v6 = vand.u32 4294901760, %v180_v3  ;;  %v857_v8 = vand.u32 4294901760, %v183_v4  ;;  %v860_v9 = vand.u32 4294901760, %v186_v7  ;;  %v189_v10 = vld [vmem:[#allocation13 + $0x70] sm:$0xff]  ;;  %v192_v11 = vld [vmem:[#allocation13 + $0x88] sm:$0xff]  ;;  %v195_v21 = vld [vmem:[#allocation13 + $0xa0] sm:$0xff] }
  0x96   :  { %v168_v12 = vld [vmem:[#allocation7] sm:$0xff]  ;;  %v5117_v14 = vsub.f32 %v177_v2, %v851_v5  ;;  %v863_v18 = vand.u32 4294901760, %v189_v10  ;;  %v866_v19 = vand.u32 4294901760, %v192_v11  ;;  %v198_v22 = vld [vmem:[#allocation13 + $0xb8] sm:$0xff]  ;;  %v5133_v26 = vshrl.u32 %v1392_v16, 7 }
  0x97   :  { %v5115_v13 = vpack.c.bf16 %v854_v6, %v851_v5  ;;  %v5119_v15 = vsub.f32 %v180_v3, %v854_v6  ;;  %170 = vst.msk [vmem:[#allocation2] sm:$0xff] %vm169_vm1, %v168_v12  ;;  %v5123_v17 = vpack.c.bf16 %v860_v9, %v857_v8  ;;  %v5126_v20 = vsub.f32 %v183_v4, %v857_v8  ;;  %v5164_v42 = vld [vmem:[%s6284_s5] sm:$0xff] }
  0x98   :  { %v5128_v23 = vsub.f32 %v186_v7, %v860_v9  ;;  %v936_v24 = vand.u32 4294901760, %v5117_v14  ;;  %v5136_v27 = vpack.c.bf16 %v866_v19, %v863_v18  ;;  %v5138_v28 = vsub.f32 %v189_v10, %v863_v18 }
  0x99   :  { %4215 = vmatpush3.bf16.msra.mxu1 %v5115_v13  ;;  %v943_v25 = vand.u32 4294901760, %v5119_v15  ;;  %v869_v29 = vand.u32 4294901760, %v195_v21  ;;  %v872_v30 = vand.u32 4294901760, %v198_v22  ;;  %v5141_v31 = vsub.f32 %v192_v11, %v866_v19 }
  0x9a   :  { %4216 = vmatprep.subr.bf16.mxu1 %v6294_v0  ;;  %v950_v33 = vand.u32 4294901760, %v5126_v20  ;;  %v937_v35 = vsub.f32 %v5117_v14, %v936_v24  ;;  %v957_v37 = vand.u32 4294901760, %v5128_v23  ;;  %v5155_v39 = vsub.s32 0, %v5133_v26 }
  0x9b   :  { %v944_v36 = vsub.f32 %v5119_v15, %v943_v25  ;;  %v5158_v40 = vpack.c.bf16 %v872_v30, %v869_v29  ;;  %v964_v41 = vand.u32 4294901760, %v5138_v28  ;;  %v5167_v43 = vsub.s32 1, %v5133_v26 }
  0x9c   :  { %v5170_v44 = vsub.f32 %v195_v21, %v869_v29  ;;  %v5172_v45 = vsub.f32 %v198_v22, %v872_v30  ;;  %v951_v47 = vsub.f32 %v5126_v20, %v950_v33  ;;  %v938_v48 = vand.u32 4294901760, %v937_v35 }
  0x9d   :  { %4218 = vmatpush3.bf16.msra.mxu1 %v5123_v17  ;;  %v945_v49 = vand.u32 4294901760, %v944_v36  ;;  %v958_v50 = vsub.f32 %v5128_v23, %v957_v37  ;;  %v971_v51 = vand.u32 4294901760, %v5141_v31  ;;  %v1601_v53 = vrot.slane %v5164_v42, %v5155_v39 }
  0x9e   :  { %4219 = vmatprep.subr.bf16.mxu1 %v6294_v0  ;;  %v173_v32 = vld [vmem:[#allocation2] sm:$0xff]  ;;  %v965_v54 = vsub.f32 %v5138_v28, %v964_v41  ;;  %v5194_v55 = vsub.s32 2, %v5133_v26  ;;  %v978_v57 = vand.u32 4294901760, %v5170_v44  ;;  %v985_v58 = vand.u32 4294901760, %v5172_v45 }
  0x9f   :  { %v201_v34 = vsel %vm169_vm1, %v173_v32, 0  ;;  %1607 = vbcast.lane.b32.xlu1 %v1601_v53, 264  ;;  %v1612_v59 = vrot.slane %v5164_v42, %v5167_v43  ;;  %v4226_v60 = vpack.c.bf16 %v945_v49, %v938_v48  ;;  %v952_v61 = vand.u32 4294901760, %v951_v47  ;;  %1603 = vbcast.lane.b32.xlu0 %v1601_v53, 256 }
  0xa0   :  { %v5152_v38 = vand.u32 4294901760, %v201_v34  ;;  %v959_v62 = vand.u32 4294901760, %v958_v50  ;;  %v972_v63 = vsub.f32 %v5141_v31, %v971_v51  ;;  %v966_v3 = vand.u32 4294901760, %v965_v54  ;;  %v1439_v54 = vld [vmem:[#allocation12 + $0x10] sm:$0xff] }
  0xa1   :  { %4221 = vmatpush3.bf16.msra.mxu1 %v5136_v27  ;;  %v1623_v4 = vrot.slane %v5164_v42, %v5194_v55  ;;  %v5212_v5 = vsub.s32 3, %v5133_v26  ;;  %v979_v8 = vsub.f32 %v5170_v44, %v978_v57  ;;  %v986_v9 = vsub.f32 %v5172_v45, %v985_v58 }
  0xa2   :  { %4222 = vmatprep.subr.bf16.mxu1 %v6294_v0  ;;  %v5175_v46 = vsub.f32 %v201_v34, %v5152_v38  ;;  %v4229_v6 = vpack.c.bf16 %v959_v62, %v952_v61  ;;  %v973_v7 = vand.u32 4294901760, %v972_v63  ;;  %v5226_v11 = vsub.s32 4, %v5133_v26 }
  0xa3   :  { %1614 = vbcast.lane.b32.xlu1 %v1612_v59, 256  ;;  %1625 = vbcast.lane.b32.xlu0 %v1623_v4, 256  ;;  %v1634_v10 = vrot.slane %v5164_v42, %v5212_v5  ;;  %v980_v18 = vand.u32 4294901760, %v979_v8  ;;  %v987_v19 = vand.u32 4294901760, %v986_v9  ;;  %v5232_v22 = vsub.s32 5, %v5133_v26  ;;  %v1445_v9 = vld [vmem:[#allocation12 + $0x40] sm:$0xff] }
  0xa4   :  { %v5185_v52 = vand.u32 4294901760, %v5175_v46  ;;  %v4232_v12 = vpack.c.bf16 %v973_v7, %v966_v3  ;;  %v1645_v21 = vrot.slane %v5164_v42, %v5226_v11  ;;  %v5238_v32 = vsub.s32 6, %v5133_v26  ;;  %v1442_v3 = vld [vmem:[#allocation12 + $0x28] sm:$0xff] }
  0xa5   :  { %4224 = vmatpush3.bf16.msra.mxu1 %v5158_v40  ;;  %v4235_v29 = vpack.c.bf16 %v987_v19, %v980_v18  ;;  %v1656_v30 = vrot.slane %v5164_v42, %v5232_v22  ;;  %v4238_v34 = vpack.c.bf16 %v5119_v15, %v5117_v14  ;;  %v4241_v36 = vpack.c.bf16 %v5128_v23, %v5126_v20 }
  0xa6   :  { %6343 = vst [vmem:[#allocation32_spill] sm:$0xff] %v5185_v52  ;;  %4225 = vmatprep.subr.bf16.mxu1 %v6294_v0  ;;  %v287_v56 = vsub.f32 %v5175_v46, %v5185_v52  ;;  %v1667_v35 = vrot.slane %v5164_v42, %v5238_v32  ;;  %v4244_v47 = vpack.c.bf16 %v5141_v31, %v5138_v28  ;;  %vm1858_vm3 = vcmask 1041409  }
  0xa7   :  { %1618 = vbcast.lane.b32.xlu1 %v1612_v59, 264  ;;  %1636 = vbcast.lane.b32.xlu0 %v1634_v10, 256  ;;  %v4247_v48 = vpack.c.bf16 %v5172_v45, %v5170_v44  ;;  %v4262_v49 = vpack.c.bf16 %v943_v25, %v936_v24  ;;  %v4265_v50 = vpack.c.bf16 %v957_v37, %v950_v33  ;;  %v1437_v44 = vld [vmem:[#allocation12] sm:$0xff]  ;;  %vm1860_vm4 = vcmask 1042434  }
  0xa8   :  { %v5206_v2 = vand.u32 4294901760, %v287_v56  ;;  %v4268_v14 = vpack.c.bf16 %v971_v51, %v964_v41  ;;  %v4271_v15 = vpack.c.bf16 %v985_v58, %v978_v57  ;;  %v1438_v51 = vld [vmem:[#allocation12 + $0x8] sm:$0xff]  ;;  %v1440_v57 = vld [vmem:[#allocation12 + $0x18] sm:$0xff]  ;;  %vm1862_vm5 = vcmask 1043459  }
  0xa9   :  { %vm1864_vm6 = vcmask 1044484   ;;  %vm1866_vm7 = vcmask 1045509   ;;  %vm1868_vm8 = vcmask 1046534   ;;  %vm1870_vm9 = vcmask 1047559  }
  0xaa   :  { %3906 = vmatmul.mubr.f32.vlgmr.msra.gmra.mrb[0].mxu1 %v5206_v2  ;;  %vm1873_vm10 = vcmask 130048  }
  0xab   :  { %4227 = vmatpush3.bf16.msra.mxu1 %v4226_v60  ;;  %3924 = vmatprep.mubr.msk.f32.mxu1 %vm4915_vm0, %v6296_v1  ;;  %v1441_v60 = vld [vmem:[#allocation12 + $0x20] sm:$0xff] }
  0xac   :  { %4228 = vmatprep.subr.bf16.mxu1 %v6294_v0  ;;  %1629 = vbcast.lane.b32.xlu1 %v1623_v4, 264 }
  0xad   :  { %1647 = vbcast.lane.b32.xlu0 %v1645_v21, 256 }
  0xaf   :  { %4230 = vmatpush3.bf16.msra.mxu1 %v4229_v6 }
  0xb0   :  { %4231 = vmatprep.subr.bf16.mxu1 %v6294_v0  ;;  %1640 = vbcast.lane.b32.xlu1 %v1634_v10, 264 }
  0xb1   :  { %1658 = vbcast.lane.b32.xlu0 %v1656_v30, 256 }
  0xb3   :  { %4233 = vmatpush3.bf16.msra.mxu1 %v4232_v12  ;;  %v1446_v12 = vld [vmem:[#allocation12 + $0x48] sm:$0xff] }
  0xb4   :  { %4234 = vmatprep.subr.bf16.mxu1 %v6294_v0  ;;  %1651 = vbcast.lane.b32.xlu1 %v1645_v21, 264 }
  0xb5   :  { %1669 = vbcast.lane.b32.xlu0 %v1667_v35, 256 }
  0xb7   :  { %4236 = vmatpush3.bf16.msra.mxu1 %v4235_v29  ;;  %v1443_v29 = vld [vmem:[#allocation12 + $0x30] sm:$0xff] }
  0xb8   :  { %4237 = vmatprep.subr.bf16.mxu1 %v6294_v0  ;;  %1662 = vbcast.lane.b32.xlu1 %v1656_v30, 264 }
  0xba   :  { %3925 = vmatmul.mubr.f32.vlgmr.msra.gmra.mrb[0].mxu1 %v5152_v38 }
  0xbb   :  { %4239 = vmatpush3.bf16.msra.mxu1 %v4238_v34  ;;  %3943 = vmatprep.mubr.msk.f32.mxu1 %vm4915_vm0, %v6296_v1  ;;  %v1444_v34 = vld [vmem:[#allocation12 + $0x38] sm:$0xff] }
  0xbc   :  { %4240 = vmatprep.subr.bf16.mxu1 %v6294_v0  ;;  %1673 = vbcast.lane.b32.xlu1 %v1667_v35, 264 }
  0xbf   :  { %4242 = vmatpush3.bf16.msra.mxu1 %v4241_v36 }
  0xc0   :  { %4243 = vmatprep.subr.bf16.mxu1 %v6294_v0 }
  0xc3   :  { %4245 = vmatpush3.bf16.msra.mxu1 %v4244_v47 }
  0xc4   :  { %4246 = vmatprep.subr.bf16.mxu1 %v6294_v0 }
  0xc7   :  { %4248 = vmatpush3.bf16.msra.mxu1 %v4247_v48  ;;  %v5316_v48 = vld [vmem:[%s6288_s9] ss:$0 sm:$0xff]  ;;  %s4919_s9 = smov 64  }
  0xc8   :  { %4249 = vmatprep.subr.bf16.mxu1 %v6294_v0 }
  0xca   :  { %3944 = vmatmul.mubr.f32.vlgmr.msra.gmra.mrb[0].mxu1 %v5175_v46 }
  0xcb   :  { %4251 = vmatpush3.bf16.msra.mxu1 %v5115_v13  ;;  %3962 = vmatprep.mubr.msk.f32.mxu1 %vm4915_vm0, %v6296_v1 }
  0xcc   :  { %4252 = vmatprep.subr.bf16.mxu1 %v6294_v0 }
  0xcf   :  { %4254 = vmatpush3.bf16.msra.mxu1 %v5123_v17 }
  0xd0   :  { %4255 = vmatprep.subr.bf16.mxu1 %v6294_v0 }
  0xd3   :  { %4257 = vmatpush3.bf16.msra.mxu1 %v5136_v27 }
  0xd4   :  { %4258 = vmatprep.subr.bf16.mxu1 %v6294_v0 }
  0xd7   :  { %4260 = vmatpush3.bf16.msra.mxu1 %v5158_v40 }
  0xd8   :  { %4261 = vmatprep.subr.bf16.mxu1 %v6294_v0 }
  0xda   :  { %3963 = vmatmul.mubr.f32.vlgmr.msra.gmra.mrb[0].mxu1 %v5185_v52 }
  0xdb   :  { %4263 = vmatpush3.bf16.msra.mxu1 %v4262_v49  ;;  %3981 = vmatprep.mubr.msk.f32.mxu1 %vm4915_vm0, %v6296_v1  ;;  %v1447_v49 = vld [vmem:[#allocation12 + $0x50] sm:$0xff] }
  0xdc   :  { %4264 = vmatprep.subr.bf16.mxu1 %v6294_v0 }
  0xdf   :  { %4266 = vmatpush3.bf16.msra.mxu1 %v4265_v50 }
  0xe0   :  { %4267 = vmatprep.subr.bf16.mxu1 %v6294_v0 }
  0xe3   :  { %4269 = vmatpush3.bf16.msra.mxu1 %v4268_v14 }
  0xe4   :  { %4270 = vmatprep.subr.bf16.mxu1 %v6294_v0 }
  0xe7   :  { %4272 = vmatpush3.bf16.msra.mxu1 %v4271_v15 }
  0xe8   :  { %4273 = vmatprep.subr.bf16.mxu1 %v6294_v0 }
  0xea   :  { %3982 = vmatmul.mubr.f32.vlgmr.msra.gmra.mrb[0].mxu1 %v5152_v38 }
  0xeb   :  { %4275 = vmatpush3.bf16.msra.mxu1 %v5115_v13  ;;  %4000 = vmatprep.mubr.msk.f32.mxu1 %vm4915_vm0, %v6296_v1  ;;  %v4917_v13 = vmov 1966171168  }
  0xec   :  { %4276 = vmatprep.subr.bf16.mxu1 %v6294_v0  ;;  %v1390_v20 = vunpack.c.l.s4 %v4917_v13  ;;  %v1448_v13 = vld [vmem:[#allocation12 + $0x58] sm:$0xff] }
  0xee   :  { %v1391_v23 = vunpack.c.0.s8 %v1390_v20 }
  0xef   :  { %4278 = vmatpush3.bf16.msra.mxu1 %v5123_v17 }
  0xf0   :  { %4279 = vmatprep.subr.bf16.mxu1 %v6294_v0  ;;  %v1394_v17 = vsub.s32 %v1391_v23, %v5133_v26 }
  0xf3   :  { %4281 = vmatpush3.bf16.msra.mxu1 %v5136_v27 }
  0xf4   :  { %4282 = vmatprep.subr.bf16.mxu1 %v6294_v0 }
  0xf7   :  { %4284 = vmatpush3.bf16.msra.mxu1 %v5158_v40 }
  0xf8   :  { %4381 = vmatprep.subr.bf16.mxu1 %v6294_v0 }
  0xfa   :  { %4001 = vmatmul.mubr.f32.vlgmr.msra.gmra.mrb[0].mxu1 %v5152_v38 }
  0xfb   :  { %4019 = vmatprep.mubr.msk.f32.mxu1 %vm4915_vm0, %v6296_v1 }
 0x1cd   :  { %v1383_v24 = vpop.f32.mrb[0].mxu1 }
 0x1ce   :  { %v1388_v25 = vcombine.high %v1383_v24, %v1383_v24  ;;  %v1395_v28 = vrot.slane %v1383_v24, %v1394_v17  ;;  %v4002_v27 = vpop.f32.mrb[1].mxu1 }
 0x1cf   :  { %v1449_v27 = vld [vmem:[#allocation12 + $0x60] sm:$0xff] }
 0x1d0   :  { %v1403_v31 = vcombine.high %v1395_v28, %v1395_v28  ;;  %v1411_v33 = vrot.slane %v1395_v28, %v1394_v17  ;;  %v1402_v37 = vrot.slane %v1388_v25, %v1394_v17 }
 0x1d2   :  { %v1425_v40 = vrot.slane %v1403_v31, %v1394_v17  ;;  %v1433_v41 = vcombine.high %v1411_v33, %v1411_v33  ;;  %v1456_v45 = vrot.slane %v1411_v33, %v5155_v39  ;;  %v1418_v56 = vrot.slane %v1402_v37, %v1394_v17 }
 0x1d3   :  { %v1404_v63 = vcombine.high %v1402_v37, %v1402_v37 }
 0x1d4   :  { %v1460_v53 = vrot.slane %v1425_v40, %v5155_v39  ;;  %v1464_v58 = vrot.slane %v1433_v41, %v5155_v39  ;;  %v1493_v59 = vadd.f32 %v1456_v45, %v1437_v44  ;;  %v1494_v61 = vadd.f32 %v1456_v45, %v1438_v51  ;;  %v1450_v44 = vld [vmem:[#allocation12 + $0x68] sm:$0xff] }
 0x1d5   :  { %v1435_v6 = vcombine.high %v1425_v40, %v1425_v40  ;;  %v1472_v7 = vrot.slane %v1418_v56, %v5155_v39  ;;  %v1432_v18 = vrot.slane %v1404_v63, %v1394_v17  ;;  %v1434_v35 = vcombine.high %v1418_v56, %v1418_v56 }
 0x1d6   :  { %v1495_v62 = vadd.f32 %v1460_v53, %v1439_v54  ;;  %v1496_v4 = vadd.f32 %v1460_v53, %v1440_v57  ;;  %v1497_v8 = vadd.f32 %v1464_v58, %v1441_v60  ;;  %4524 = vtanh.f32 %v1493_v59  ;;  %v1451_v57 = vld [vmem:[#allocation12 + $0x70] sm:$0xff] }
 0x1d7   :  { %4526 = vtanh.f32 %v1494_v61  ;;  %v1498_v10 = vadd.f32 %v1464_v58, %v1442_v3  ;;  %v1468_v19 = vrot.slane %v1435_v6, %v5155_v39  ;;  %v1501_v21 = vadd.f32 %v1472_v7, %v1445_v9 }
 0x1d8   :  { %4528 = vtanh.f32 %v1495_v62  ;;  %v1502_v30 = vadd.f32 %v1472_v7, %v1446_v12  ;;  %v1476_v36 = vrot.slane %v1432_v18, %v5155_v39  ;;  %v1436_v17 = vcombine.high %v1432_v18, %v1432_v18  ;;  %v1452_v62 = vld [vmem:[#allocation12 + $0x78] sm:$0xff] }
 0x1d9   :  { %4530 = vtanh.f32 %v1496_v4  ;;  %v1499_v47 = vadd.f32 %v1468_v19, %v1443_v29  ;;  %v1500_v14 = vadd.f32 %v1468_v19, %v1444_v34  ;;  %v1480_v24 = vrot.slane %v1434_v35, %v5155_v39 }
 0x1da   :  { %4532 = vtanh.f32 %v1497_v8  ;;  %v1503_v25 = vadd.f32 %v1476_v36, %v1447_v49  ;;  %v1504_v41 = vadd.f32 %v1476_v36, %v1448_v13  ;;  %v1484_v54 = vrot.slane %v1436_v17, %v5155_v39 }
 0x1db   :  { %4534 = vtanh.f32 %v1498_v10  ;;  %v1505_v56 = vadd.f32 %v1480_v24, %v1449_v27  ;;  %v1506_v61 = vadd.f32 %v1480_v24, %v1450_v44 }
 0x1dc   :  { %4536 = vtanh.f32 %v1501_v21  ;;  %v1507_v6 = vadd.f32 %v1484_v54, %v1451_v57  ;;  %v1508_v10 = vadd.f32 %v1484_v54, %v1452_v62 }
 0x1dd   :  { %4538 = vtanh.f32 %v1502_v30 }
 0x1de   :  { %4540 = vtanh.f32 %v1499_v47 }
 0x1df   :  { %4542 = vtanh.f32 %v1500_v14 }
 0x1e0   :  { %v4525_v50 = vpop.eup %4524  ;;  %4544 = vtanh.f32 %v1503_v25 }
 0x1e1   :  { %v4527_v15 = vpop.eup %4526  ;;  %v1532_v20 = vmul.f32 %v4525_v50, %v5316_v48  ;;  %4546 = vtanh.f32 %v1504_v41  ;;  %v4918_v50 = vmov 0  }
 0x1e2   :  { %v4529_v23 = vpop.eup %4528  ;;  %v1533_v37 = vmul.f32 %v4527_v15, %v5316_v48  ;;  %4548 = vtanh.f32 %v1505_v56  ;;  %4522 = vset.pattern.permute.xlu0 %v4918_v50  ;;  %4523 = vset.pattern.permute.xlu1 %v4918_v50  ;;  %v1604_v56 = vpop.permute.xlu0 %1603 }
 0x1e3   :  { %v4531_v28 = vpop.eup %4530  ;;  %v1548_v31 = vsel %vm169_vm1, %v1532_v20, 0.0  ;;  %v1534_v33 = vmul.f32 %v4529_v23, %v5316_v48  ;;  %4550 = vtanh.f32 %v1506_v61 }
 0x1e4   :  { %v4533_v40 = vpop.eup %4532  ;;  %1549 = vadd.xlane.f32.xlu0 %v1548_v31  ;;  %v1535_v51 = vmul.f32 %v4531_v28, %v5316_v48  ;;  %v1551_v58 = vsel %vm169_vm1, %v1533_v37, 0.0  ;;  %4552 = vtanh.f32 %v1507_v6 }
 0x1e5   :  { %v1554_v45 = vsel %vm169_vm1, %v1534_v33, 0.0  ;;  %v4535_v53 = vpop.eup %4534  ;;  %v1536_v59 = vmul.f32 %v4533_v40, %v5316_v48  ;;  %4554 = vtanh.f32 %v1508_v10 }
 0x1e6   :  { %1555 = vadd.xlane.f32.xlu1 %v1554_v45  ;;  %v4537_v60 = vpop.eup %4536  ;;  %v1557_v63 = vsel %vm169_vm1, %v1535_v51, 0.0  ;;  %v1537_v3 = vmul.f32 %v4535_v53, %v5316_v48  ;;  %v5353_v45 = vsub.s32 7, %v5133_v26  ;;  %v1608_v53 = vpop.permute.xlu1 %1607 }
 0x1e7   :  { %v4539_v4 = vpop.eup %4538  ;;  %v1560_v7 = vsel %vm169_vm1, %v1536_v59, 0.0  ;;  %v1540_v8 = vmul.f32 %v4537_v60, %v5316_v48 }
 0x1e8   :  { %1552 = vadd.xlane.f32.xlu0 %v1551_v58  ;;  %v4541_v9 = vpop.eup %4540  ;;  %v1563_v12 = vsel %vm169_vm1, %v1537_v3, 0.0  ;;  %v1541_v18 = vmul.f32 %v4539_v4, %v5316_v48  ;;  %v1678_v51 = vrot.slane %v5164_v42, %v5353_v45 }
 0x1e9   :  { %v4543_v19 = vpop.eup %4542  ;;  %v1572_v21 = vsel %vm169_vm1, %v1540_v8, 0.0  ;;  %v1538_v29 = vmul.f32 %v4541_v9, %v5316_v48 }
 0x1ea   :  { %1558 = vadd.xlane.f32.xlu1 %v1557_v63  ;;  %v4545_v30 = vpop.eup %4544  ;;  %v1575_v34 = vsel %vm169_vm1, %v1541_v18, 0.0  ;;  %v1539_v35 = vmul.f32 %v4543_v19, %v5316_v48  ;;  %v1615_v54 = vpop.permute.xlu1 %1614 }
 0x1eb   :  { %v4547_v36 = vpop.eup %4546  ;;  %v1566_v47 = vsel %vm169_vm1, %v1538_v29, 0.0  ;;  %v1542_v49 = vmul.f32 %v4545_v30, %v5316_v48 }
 0x1ec   :  { %1561 = vadd.xlane.f32.xlu0 %v1560_v7  ;;  %v4549_v14 = vpop.eup %4548  ;;  %v1569_v15 = vsel %vm169_vm1, %v1539_v35, 0.0  ;;  %v1543_v13 = vmul.f32 %v4547_v36, %v5316_v48 }
 0x1ed   :  { %v4551_v20 = vpop.eup %4550  ;;  %v1578_v23 = vsel %vm169_vm1, %v1542_v49, 0.0  ;;  %v1544_v17 = vmul.f32 %v4549_v14, %v5316_v48 }
 0x1ee   :  { %1564 = vadd.xlane.f32.xlu1 %v1563_v12  ;;  %v4553_v24 = vpop.eup %4552  ;;  %v1581_v25 = vsel %vm169_vm1, %v1543_v13, 0.0  ;;  %v1545_v28 = vmul.f32 %v4551_v20, %v5316_v48  ;;  %v1619_v57 = vpop.permute.xlu1 %1618 }
 0x1ef   :  { %v4555_v27 = vpop.eup %4554  ;;  %v1584_v31 = vsel %vm169_vm1, %v1544_v17, 0.0  ;;  %v1546_v33 = vmul.f32 %v4553_v24, %v5316_v48 }
 0x1f0   :  { %1573 = vadd.xlane.f32.xlu0 %v1572_v21  ;;  %v1587_v37 = vsel %vm169_vm1, %v1545_v28, 0.0  ;;  %v1547_v40 = vmul.f32 %v4555_v27, %v5316_v48  ;;  %v1626_v48 = vpop.permute.xlu0 %1625 }
 0x1f1   :  { %v1590_v41 = vsel %vm169_vm1, %v1546_v33, 0.0 }
 0x1f2   :  { %1576 = vadd.xlane.f32.xlu1 %v1575_v34  ;;  %v1593_v44 = vsel %vm169_vm1, %v1547_v40, 0.0  ;;  %v1630_v58 = vpop.permute.xlu1 %1629 }
 0x1f4   :  { %1567 = vadd.xlane.f32.xlu0 %v1566_v47  ;;  %v1637_v59 = vpop.permute.xlu0 %1636 }
 0x1f6   :  { %1570 = vadd.xlane.f32.xlu1 %v1569_v15  ;;  %v1641_v60 = vpop.permute.xlu1 %1640 }
 0x1f8   :  { %1579 = vadd.xlane.f32.xlu0 %v1578_v23  ;;  %v1648_v61 = vpop.permute.xlu0 %1647 }
 0x1fa   :  { %1582 = vadd.xlane.f32.xlu1 %v1581_v25  ;;  %v1652_v62 = vpop.permute.xlu1 %1651 }
 0x1fc   :  { %1585 = vadd.xlane.f32.xlu0 %v1584_v31  ;;  %v1659_v63 = vpop.permute.xlu0 %1658 }
 0x1fe   :  { %1588 = vadd.xlane.f32.xlu1 %v1587_v37  ;;  %v1663_v3 = vpop.permute.xlu1 %1662 }
 0x200   :  { %1591 = vadd.xlane.f32.xlu0 %v1590_v41  ;;  %v1670_v4 = vpop.permute.xlu0 %1669 }
 0x202   :  { %1594 = vadd.xlane.f32.xlu1 %v1593_v44  ;;  %v1674_v6 = vpop.permute.xlu1 %1673 }
 0x213   :  { %1684 = vbcast.lane.b32.xlu1 %v1678_v51, 264 }
 0x216   :  { %1680 = vbcast.lane.b32.xlu0 %v1678_v51, 256 }
 0x271   :  { %v1550_v7 = vpop.xlane.xlu0 %1549 }
 0x272   :  { %v5357_v8 = vadd.f32 %v1604_v56, %v1550_v7 }
 0x273   :  { %v1556_v42 = vpop.xlane.xlu1 %1555 }
 0x274   :  { %1735 = vperm.xlu0 %4522, %v5357_v8   ;;  %v5365_v21 = vadd.f32 %v1615_v54, %v1556_v42 }
 0x275   :  { %v1553_v9 = vpop.xlane.xlu0 %1552 }
 0x276   :  { %v5360_v10 = vadd.f32 %v1608_v53, %v1553_v9 }
 0x277   :  { %v1559_v12 = vpop.xlane.xlu1 %1558 }
 0x278   :  { %v5362_v18 = vadd.f32 %v1619_v57, %v1559_v12  ;;  %1738 = vperm.xlu1 %4523, %v5360_v10  }
 0x279   :  { %v1562_v19 = vpop.xlane.xlu0 %1561 }
 0x27a   :  { %1744 = vperm.xlu0 %4522, %v5362_v18   ;;  %v5371_v35 = vadd.f32 %v1626_v48, %v1562_v19 }
 0x27b   :  { %v1565_v29 = vpop.xlane.xlu1 %1564 }
 0x27c   :  { %v5368_v30 = vadd.f32 %v1630_v58, %v1565_v29  ;;  %1741 = vperm.xlu1 %4523, %v5365_v21  }
 0x27d   :  { %v1574_v34 = vpop.xlane.xlu0 %1573 }
 0x27e   :  { %1750 = vperm.xlu0 %4522, %v5368_v30   ;;  %v5377_v50 = vadd.f32 %v1648_v61, %v1574_v34 }
 0x27f   :  { %v1577_v36 = vpop.xlane.xlu1 %1576 }
 0x280   :  { %v5374_v47 = vadd.f32 %v1652_v62, %v1577_v36  ;;  %1747 = vperm.xlu1 %4523, %v5371_v35  }
 0x281   :  { %v1568_v49 = vpop.xlane.xlu0 %1567 }
 0x282   :  { %1762 = vperm.xlu0 %4522, %v5374_v47   ;;  %v5383_v20 = vadd.f32 %v1637_v59, %v1568_v49 }
 0x283   :  { %v1571_v14 = vpop.xlane.xlu1 %1570 }
 0x284   :  { %v5380_v15 = vadd.f32 %v1641_v60, %v1571_v14  ;;  %1759 = vperm.xlu1 %4523, %v5377_v50   ;;  %v1783_v60 = vand.u32 127, %v1392_v16 }
 0x285   :  { %v1580_v13 = vpop.xlane.xlu0 %1579 }
 0x286   :  { %1756 = vperm.xlu0 %4522, %v5380_v15   ;;  %v5389_v25 = vadd.f32 %v1659_v63, %v1580_v13  ;;  %v1788_v62 = vadd.s32 4294967288, %v1783_v60 }
 0x287   :  { %v1583_v23 = vpop.xlane.xlu1 %1582 }
 0x288   :  { %v5386_v17 = vadd.f32 %v1663_v3, %v1583_v23  ;;  %1753 = vperm.xlu1 %4523, %v5383_v20  }
 0x289   :  { %v1586_v24 = vpop.xlane.xlu0 %1585 }
 0x28a   :  { %1768 = vperm.xlu0 %4522, %v5386_v17   ;;  %v5395_v33 = vadd.f32 %v1670_v4, %v1586_v24  ;;  %v5407_v4 = vsub.s32 %v1783_v60, %v5133_v26 }
 0x28b   :  { %v1589_v28 = vpop.xlane.xlu1 %1588 }
 0x28c   :  { %v5392_v27 = vadd.f32 %v1674_v6, %v1589_v28  ;;  %1765 = vperm.xlu1 %4523, %v5389_v25   ;;  %6344 = vst [vmem:[#allocation33_spill] sm:$0xff] %v5407_v4  ;;  %v5410_v6 = vsub.s32 %v1788_v62, %v5133_v26 }
 0x28d   :  { %v1592_v31 = vpop.xlane.xlu0 %1591 }
 0x28e   :  { %1774 = vperm.xlu0 %4522, %v5392_v27   ;;  %6345 = vst [vmem:[#allocation34_spill] sm:$0xff] %v5410_v6 }
 0x28f   :  { %v1595_v37 = vpop.xlane.xlu1 %1594 }
 0x290   :  { %1771 = vperm.xlu1 %4523, %v5395_v33  }
 0x291   :  { %v1681_v40 = vpop.permute.xlu0 %1680 }
 0x292   :  { %v5399_v41 = vadd.f32 %v1681_v40, %v1592_v31 }
 0x293   :  { %v1685_v44 = vpop.permute.xlu1 %1684 }
 0x294   :  { %v5401_v51 = vadd.f32 %v1685_v44, %v1595_v37  ;;  %1777 = vperm.xlu1 %4523, %v5399_v41  }
 0x296   :  { %1780 = vperm.xlu0 %4522, %v5401_v51  }
 0x2f3   :  { %v1736_v53 = vpop.permute.xlu0 %1735 }
 0x2f4   :  { %v1787_v36 = vrot.slane %v1736_v53, %v5407_v4 }
 0x2f7   :  { %v1739_v54 = vpop.permute.xlu1 %1738 }
 0x2f8   :  { %v1792_v19 = vrot.slane %v1739_v54, %v5410_v6 }
 0x2f9   :  { %v1745_v56 = vpop.permute.xlu0 %1744 }
 0x2fa   :  { %v1802_v16 = vrot.slane %v1745_v56, %v5410_v6  ;;  %v1794_v23 = vsel %vm1793_vm2, %v1792_v19, %v1787_v36 }
 0x2fb   :  { %v1742_v57 = vpop.permute.xlu1 %1741 }
 0x2fc   :  { %v1798_v7 = vrot.slane %v1742_v57, %v5407_v4 }
 0x2fd   :  { %v1751_v48 = vpop.permute.xlu0 %1750 }
 0x2fe   :  { %v1811_v34 = vrot.slane %v1751_v48, %v5410_v6  ;;  %v1803_v26 = vsel %vm1793_vm2, %v1802_v16, %v1798_v7 }
 0x2ff   :  { %v1748_v58 = vpop.permute.xlu1 %1747  ;;  %v1859_v37 = vsel %vm1858_vm3, %v1803_v26, %v1794_v23 }
 0x300   :  { %v1807_v9 = vrot.slane %v1748_v58, %v5407_v4 }
 0x301   :  { %v1763_v59 = vpop.permute.xlu0 %1762 }
 0x302   :  { %v1812_v14 = vsel %vm1793_vm2, %v1811_v34, %v1807_v9  ;;  %v1829_v56 = vrot.slane %v1763_v59, %v5410_v6 }
 0x303   :  { %v1760_v61 = vpop.permute.xlu1 %1759  ;;  %v1861_v53 = vsel %vm1860_vm4, %v1812_v14, %v1859_v37 }
 0x304   :  { %v1825_v40 = vrot.slane %v1760_v61, %v5407_v4 }
 0x305   :  { %v1757_v63 = vpop.permute.xlu0 %1756 }
 0x306   :  { %v1820_v49 = vrot.slane %v1757_v63, %v5410_v6  ;;  %v1830_v62 = vsel %vm1793_vm2, %v1829_v56, %v1825_v40 }
 0x307   :  { %v1754_v3 = vpop.permute.xlu1 %1753 }
 0x308   :  { %v1816_v29 = vrot.slane %v1754_v3, %v5407_v4 }
 0x309   :  { %v1769_v42 = vpop.permute.xlu0 %1768 }
 0x30a   :  { %v1821_v24 = vsel %vm1793_vm2, %v1820_v49, %v1816_v29  ;;  %v1838_v54 = vrot.slane %v1769_v42, %v5410_v6 }
 0x30b   :  { %v1766_v12 = vpop.permute.xlu1 %1765  ;;  %v1863_v57 = vsel %vm1862_vm5, %v1821_v24, %v1861_v53 }
 0x30c   :  { %v1834_v28 = vrot.slane %v1766_v12, %v5407_v4  ;;  %v1865_v59 = vsel %vm1864_vm6, %v1830_v62, %v1863_v57 }
 0x30d   :  { %v1775_v31 = vpop.permute.xlu0 %1774 }
 0x30e   :  { %v1847_v48 = vrot.slane %v1775_v31, %v5410_v6  ;;  %v1839_v60 = vsel %vm1793_vm2, %v1838_v54, %v1834_v28 }
 0x30f   :  { %v1772_v13 = vpop.permute.xlu1 %1771  ;;  %v1867_v42 = vsel %vm1866_vm7, %v1839_v60, %v1865_v59 }
 0x310   :  { %v1843_v44 = vrot.slane %v1772_v13, %v5407_v4 }
 0x312   :  { %v1848_v61 = vsel %vm1793_vm2, %v1847_v48, %v1843_v44 }
 0x313   :  { %v1778_v58 = vpop.permute.xlu1 %1777  ;;  %v1869_v12 = vsel %vm1868_vm8, %v1848_v61, %v1867_v42 }
 0x314   :  { %v1852_v3 = vrot.slane %v1778_v58, %v5407_v4 }
 0x315   :  { %v1781_v63 = vpop.permute.xlu0 %1780 }
 0x316   :  { %v1856_v7 = vrot.slane %v1781_v63, %v5410_v6 }
 0x318   :  { %v1857_v9 = vsel %vm1793_vm2, %v1856_v7, %v1852_v3 }
 0x319   :  { %v1871_v19 = vsel %vm1870_vm9, %v1857_v9, %v1869_v12 }
 0x31a   :  { %v1874_v16 = vsel %vm1873_vm10, %v1871_v19, -inf }
 0x31b   :  { %1875 = vmax.xlane.f32.xlu1 %v1874_v16 }
 0x3a8   :  { %v1876_v29 = vpop.xlane.xlu1 %1875 }
 0x3a9   :  { %v1881_v34 = vrot.slane %v1876_v29, %v5155_v39  ;;  %v1885_v26 = vrot.slane %v1876_v29, %v5167_v43  ;;  %v1897_v14 = vrot.slane %v1876_v29, %v5226_v11  ;;  %v5452_v31 = vrot.slane %v1876_v29, %v5353_v45 }
 0x3aa   :  { %v1889_v37 = vrot.slane %v1876_v29, %v5194_v55  ;;  %v1893_v56 = vrot.slane %v1876_v29, %v5212_v5 }
 0x3ab   :  { %v1918_v36 = vsub.f32 %v5357_v8, %v1881_v34  ;;  %v1919_v49 = vsub.f32 %v5360_v10, %v1881_v34  ;;  %v1920_v23 = vsub.f32 %v5365_v21, %v1885_v26  ;;  %v1927_v28 = vsub.f32 %v5374_v47, %v1897_v14 }
 0x3ac   :  { %v1921_v8 = vsub.f32 %v5362_v18, %v1885_v26  ;;  %v1933_v10 = vsub.f32 %v5401_v51, %v5452_v31  ;;  %v1922_v53 = vsub.f32 %v5371_v35, %v1889_v37  ;;  %v1923_v18 = vsub.f32 %v5368_v30, %v1889_v37 }
 0x3ad   :  { %v1934_v13 = vmul.f32 1.442695, %v1918_v36  ;;  %v1936_v24 = vmul.f32 1.442695, %v1919_v49  ;;  %v1938_v40 = vmul.f32 1.442695, %v1920_v23  ;;  %v1924_v35 = vsub.f32 %v5383_v20, %v1893_v56 }
 0x3ae   :  { %v1952_v44 = vmul.f32 1.442695, %v1927_v28  ;;  %v1940_v21 = vmul.f32 1.442695, %v1921_v8  ;;  %v1964_v47 = vmul.f32 1.442695, %v1933_v10  ;;  %v1925_v62 = vsub.f32 %v5380_v15, %v1893_v56 }
 0x3af   :  { %4556 = vpow2.f32 %v1934_v13  ;;  %v1942_v57 = vmul.f32 1.442695, %v1922_v53  ;;  %v1944_v51 = vmul.f32 1.442695, %v1923_v18  ;;  %v1946_v30 = vmul.f32 1.442695, %v1924_v35 }
 0x3b0   :  { %4558 = vpow2.f32 %v1936_v24  ;;  %v1901_v20 = vrot.slane %v1876_v29, %v5232_v22  ;;  %v1926_v63 = vsub.f32 %v5377_v50, %v1897_v14  ;;  %v1948_v3 = vmul.f32 1.442695, %v1925_v62 }
 0x3b1   :  { %4560 = vpow2.f32 %v1938_v40  ;;  %v1905_v50 = vrot.slane %v1876_v29, %v5238_v32 }
 0x3b2   :  { %4562 = vpow2.f32 %v1952_v44  ;;  %v1928_v15 = vsub.f32 %v5389_v25, %v1901_v20  ;;  %v1950_v42 = vmul.f32 1.442695, %v1926_v63  ;;  %v1929_v12 = vsub.f32 %v5386_v17, %v1901_v20 }
 0x3b3   :  { %4564 = vpow2.f32 %v1940_v21  ;;  %v1930_v34 = vsub.f32 %v5395_v33, %v1905_v50  ;;  %v1931_v26 = vsub.f32 %v5392_v27, %v1905_v50  ;;  %v1932_v17 = vsub.f32 %v5399_v41, %v5452_v31 }
 0x3b4   :  { %4566 = vpow2.f32 %v1964_v47  ;;  %v1954_v19 = vmul.f32 1.442695, %v1928_v15  ;;  %v1956_v25 = vmul.f32 1.442695, %v1929_v12 }
 0x3b5   :  { %4568 = vpow2.f32 %v1942_v57  ;;  %v1958_v29 = vmul.f32 1.442695, %v1930_v34  ;;  %v1960_v14 = vmul.f32 1.442695, %v1931_v26  ;;  %v1962_v13 = vmul.f32 1.442695, %v1932_v17 }
 0x3b6   :  { %4570 = vpow2.f32 %v1944_v51 }
 0x3b7   :  { %4572 = vpow2.f32 %v1946_v30 }
 0x3b8   :  { %4574 = vpow2.f32 %v1948_v3 }
 0x3b9   :  { %v5459_v54 = vpop.eup %4556  ;;  %4576 = vpow2.f32 %v1950_v42 }
 0x3ba   :  { %1983 = vperm.xlu0 %4522, %v5459_v54   ;;  %v5464_v48 = vpop.eup %4558  ;;  %4578 = vpow2.f32 %v1954_v19 }
 0x3bb   :  { %v5468_v58 = vpop.eup %4560  ;;  %4580 = vpow2.f32 %v1956_v25 }
 0x3bc   :  { %v5470_v60 = vpop.eup %4562  ;;  %4582 = vpow2.f32 %v1958_v29 }
 0x3bd   :  { %2010 = vperm.xlu1 %4523, %v5470_v60   ;;  %v5475_v61 = vpop.eup %4564  ;;  %4584 = vpow2.f32 %v1960_v14 }
 0x3be   :  { %1986 = vperm.xlu0 %4522, %v5464_v48   ;;  %v5480_v7 = vpop.eup %4566  ;;  %4586 = vpow2.f32 %v1962_v13 }
 0x3bf   :  { %v5482_v59 = vpop.eup %4568 }
 0x3c0   :  { %v5487_v9 = vpop.eup %4570 }
 0x3c1   :  { %2028 = vperm.xlu1 %4523, %v5480_v7   ;;  %v5492_v16 = vpop.eup %4572 }
 0x3c2   :  { %1989 = vperm.xlu0 %4522, %v5468_v58   ;;  %v5496_v36 = vpop.eup %4574 }
 0x3c3   :  { %v5500_v49 = vpop.eup %4576 }
 0x3c4   :  { %v5505_v33 = vpop.eup %4578 }
 0x3c5   :  { %v5508_v23 = vpop.eup %4580 }
 0x3c6   :  { %1992 = vperm.xlu0 %4522, %v5475_v61   ;;  %6346 = vst [vmem:[#allocation35_spill] sm:$0xff] %v5508_v23  ;;  %v5511_v27 = vpop.eup %4582 }
 0x3c7   :  { %6347 = vst [vmem:[#allocation36_spill] sm:$0xff] %v5511_v27  ;;  %v5514_v24 = vpop.eup %4584 }
 0x3c8   :  { %6348 = vst [vmem:[#allocation37_spill] sm:$0xff] %v5514_v24  ;;  %v5517_v41 = vpop.eup %4586 }
 0x3c9   :  { %6349 = vst [vmem:[#allocation38_spill] sm:$0xff] %v5517_v41 }
 0x3ca   :  { %1995 = vperm.xlu0 %4522, %v5482_v59  }
 0x3ce   :  { %1998 = vperm.xlu0 %4522, %v5487_v9  }
 0x3d2   :  { %2001 = vperm.xlu0 %4522, %v5492_v16  }
 0x3d6   :  { %2004 = vperm.xlu0 %4522, %v5496_v36  }
 0x3da   :  { %2007 = vperm.xlu0 %4522, %v5500_v49  }
 0x3de   :  { %2013 = vperm.xlu0 %4522, %v5505_v33  }
 0x3e2   :  { %2016 = vperm.xlu0 %4522, %v5508_v23  }
 0x3e6   :  { %2019 = vperm.xlu0 %4522, %v5511_v27  }
 0x3ea   :  { %2022 = vperm.xlu0 %4522, %v5514_v24  }
 0x3ee   :  { %2025 = vperm.xlu0 %4522, %v5517_v41  }
 0x439   :  { %v1984_v28 = vpop.permute.xlu0 %1983 }
 0x43a   :  { %v2033_v15 = vrot.slane %v1984_v28, %v5407_v4 }
 0x43c   :  { %v2011_v57 = vpop.permute.xlu1 %2010 }
 0x43d   :  { %v1987_v31 = vpop.permute.xlu0 %1986  ;;  %v2073_v19 = vrot.slane %v2011_v57, %v5410_v6 }
 0x43e   :  { %v2037_v62 = vrot.slane %v1987_v31, %v5410_v6 }
 0x440   :  { %v2038_v26 = vsel %vm1793_vm2, %v2037_v62, %v2033_v15  ;;  %v2029_v13 = vpop.permute.xlu1 %2028 }
 0x441   :  { %v1990_v37 = vpop.permute.xlu0 %1989 }
 0x442   :  { %v2042_v30 = vrot.slane %v1990_v37, %v5407_v4 }
 0x445   :  { %v1993_v8 = vpop.permute.xlu0 %1992 }
 0x446   :  { %v2046_v18 = vrot.slane %v1993_v8, %v5410_v6 }
 0x448   :  { %v2047_v42 = vsel %vm1793_vm2, %v2046_v18, %v2042_v30  ;;  %v176_v30 = vld [vmem:[#allocation13 + $0x8] sm:$0xff] }
 0x449   :  { %v1996_v40 = vpop.permute.xlu0 %1995  ;;  %v2102_v28 = vsel %vm1858_vm3, %v2047_v42, %v2038_v26  ;;  %v178_v42 = vld [vmem:[#allocation13 + $0x18] sm:$0xff] }
 0x44a   :  { %v2051_v63 = vrot.slane %v1996_v40, %v5407_v4 }
 0x44d   :  { %v1999_v44 = vpop.permute.xlu0 %1998 }
 0x44e   :  { %v2055_v35 = vrot.slane %v1999_v44, %v5410_v6 }
 0x450   :  { %v2056_v34 = vsel %vm1793_vm2, %v2055_v35, %v2051_v63  ;;  %v175_v63 = vld [vmem:[#allocation13] sm:$0xff] }
 0x451   :  { %v2002_v10 = vpop.permute.xlu0 %2001  ;;  %v2103_v8 = vsel %vm1860_vm4, %v2056_v34, %v2102_v28  ;;  %v209_v34 = vand.u32 4294901760, %v178_v42 }
 0x452   :  { %v2060_v50 = vrot.slane %v2002_v10, %v5407_v4 }
 0x455   :  { %v2005_v53 = vpop.permute.xlu0 %2004 }
 0x456   :  { %v2064_v20 = vrot.slane %v2005_v53, %v5410_v6 }
 0x458   :  { %v2065_v29 = vsel %vm1793_vm2, %v2064_v20, %v2060_v50  ;;  %v179_v20 = vld [vmem:[#allocation13 + $0x20] sm:$0xff]  ;;  %v205_v50 = vand.u32 4294901760, %v175_v63 }
 0x459   :  { %v2008_v21 = vpop.permute.xlu0 %2007  ;;  %v2104_v44 = vsel %vm1862_vm5, %v2065_v29, %v2103_v8  ;;  %v207_v15 = vand.u32 4294901760, %v179_v20  ;;  %v181_v29 = vld [vmem:[#allocation13 + $0x30] sm:$0xff]  ;;  %v191_v8 = vld [vmem:[#allocation13 + $0x80] sm:$0xff] }
 0x45a   :  { %v2069_v3 = vrot.slane %v2008_v21, %v5407_v4  ;;  %v2100_v21 = vrot.slane %v2029_v13, %v5410_v6 }
 0x45c   :  { %v2074_v31 = vsel %vm1793_vm2, %v2073_v19, %v2069_v3  ;;  %v203_v3 = vand.u32 4294901760, %v176_v30  ;;  %v185_v19 = vld [vmem:[#allocation13 + $0x50] sm:$0xff] }
 0x45d   :  { %v2014_v47 = vpop.permute.xlu0 %2013  ;;  %v215_v26 = vand.u32 4294901760, %v185_v19 }
 0x45e   :  { %v2078_v17 = vrot.slane %v2014_v47, %v5407_v4  ;;  %v2105_v47 = vsel %vm1864_vm6, %v2074_v31, %v2104_v44  ;;  %v5552_v13 = vpack.c.bf16 %v207_v15, %v203_v3  ;;  %v5554_v28 = vsub.f32 %v176_v30, %v203_v3  ;;  %v190_v44 = vld [vmem:[#allocation13 + $0x78] sm:$0xff] }
 0x45f   :  { %v5556_v31 = vsub.f32 %v179_v20, %v207_v15  ;;  %v225_v20 = vand.u32 4294901760, %v190_v44  ;;  %v193_v15 = vld [vmem:[#allocation13 + $0x90] sm:$0xff] }
 0x460   :  { %4118 = vmatprep.subr.bf16.mxu0 %v5552_v13 }
 0x461   :  { %v2017_v56 = vpop.permute.xlu0 %2016 }
 0x462   :  { %v2082_v12 = vrot.slane %v2017_v56, %v5410_v6 }
 0x464   :  { %v2083_v40 = vsel %vm1793_vm2, %v2082_v12, %v2078_v17  ;;  %v182_v12 = vld [vmem:[#allocation13 + $0x38] sm:$0xff]  ;;  %v184_v17 = vld [vmem:[#allocation13 + $0x48] sm:$0xff] }
 0x465   :  { %v2020_v51 = vpop.permute.xlu0 %2019  ;;  %v2106_v18 = vsel %vm1866_vm7, %v2083_v40, %v2105_v47  ;;  %v187_v40 = vld [vmem:[#allocation13 + $0x60] sm:$0xff] }
 0x466   :  { %v2087_v37 = vrot.slane %v2020_v51, %v5407_v4  ;;  %v221_v30 = vand.u32 4294901760, %v187_v40 }
 0x468   :  { %v5585_v0 = vpack.c.bf16 %v225_v20, %v221_v30  ;;  %v5587_v1 = vsub.f32 %v187_v40, %v221_v30 }
 0x469   :  { %v2023_v25 = vpop.permute.xlu0 %2022 }
 0x46a   :  { %v2091_v14 = vrot.slane %v2023_v25, %v5410_v6  ;;  %v211_v25 = vand.u32 4294901760, %v182_v12  ;;  %6350 = vst [vmem:[#allocation39_spill] sm:$0xff] %v5585_v0  ;;  %v5589_v6 = vsub.f32 %v190_v44, %v225_v20 }
 0x46c   :  { %v2092_v10 = vsel %vm1793_vm2, %v2091_v14, %v2087_v37  ;;  %v188_v14 = vld [vmem:[#allocation13 + $0x68] sm:$0xff]  ;;  %v5558_v37 = vsub.f32 %v175_v63, %v205_v50  ;;  %v5566_v47 = vsub.f32 %v182_v12, %v211_v25  ;;  %v197_v63 = vld [vmem:[#allocation13 + $0xb0] sm:$0xff] }
 0x46d   :  { %v2026_v53 = vpop.permute.xlu0 %2025  ;;  %v2107_v35 = vsel %vm1868_vm8, %v2092_v10, %v2106_v18  ;;  %v5560_v10 = vpack.c.bf16 %v209_v34, %v205_v50  ;;  %v5569_v18 = vsub.f32 %v185_v19, %v215_v26 }
 0x46e   :  { %v2096_v56 = vrot.slane %v2026_v53, %v5407_v4  ;;  %v5562_v53 = vsub.f32 %v178_v42, %v209_v34  ;;  %v196_v34 = vld [vmem:[#allocation13 + $0xa8] sm:$0xff]  ;;  %v231_v4 = vand.u32 4294901760, %v197_v63 }
 0x46f   :  { %4120 = vmatpush1.bf16.msra.mxu0 %v5560_v10 }
 0x470   :  { %v2101_v57 = vsel %vm1793_vm2, %v2100_v21, %v2096_v56  ;;  %v5564_v21 = vpack.c.bf16 %v215_v26, %v211_v25  ;;  %v194_v56 = vld [vmem:[#allocation13 + $0x98] sm:$0xff]  ;;  %v5600_v40 = vsub.f32 %v197_v63, %v231_v4 }
 0x471   :  { %v2108_v51 = vsel %vm1870_vm9, %v2101_v57, %v2107_v35  ;;  %v213_v57 = vand.u32 4294901760, %v181_v29  ;;  %v217_v35 = vand.u32 4294901760, %v184_v17  ;;  %v227_v3 = vand.u32 4294901760, %v194_v56 }
 0x472   :  { %v2110_v62 = vsel %vm1873_vm10, %v2108_v51, 0.0  ;;  %v219_v51 = vand.u32 4294901760, %v188_v14  ;;  %4122 = vmatprep.subr.bf16.mxu0 %v5564_v21 }
 0x473   :  { %2111 = vadd.xlane.f32.xlu0 %v2110_v62  ;;  %v223_v62 = vand.u32 4294901760, %v191_v8  ;;  %v5573_v42 = vpack.c.bf16 %v217_v35, %v213_v57  ;;  %v5575_v50 = vsub.f32 %v181_v29, %v213_v57  ;;  %v5577_v12 = vsub.f32 %v184_v17, %v217_v35 }
 0x474   :  { %v5579_v19 = vsub.f32 %v188_v14, %v219_v51  ;;  %v5591_v41 = vsub.f32 %v194_v56, %v227_v3  ;;  %v229_v29 = vand.u32 4294901760, %v193_v15  ;;  %v233_v17 = vand.u32 4294901760, %v196_v34 }
 0x475   :  { %v5581_v25 = vpack.c.bf16 %v223_v62, %v219_v51  ;;  %v5583_v26 = vsub.f32 %v191_v8, %v223_v62  ;;  %4124 = vmatpush1.bf16.msra.mxu0 %v5573_v42  ;;  %v6304_v14 = vand.u32 4294901760, %v5554_v28  ;;  %v6303_v57 = vand.u32 4294901760, %v5556_v31 }
 0x476   :  { %v6305_v8 = vand.u32 4294901760, %v5558_v37  ;;  %v5598_v35 = vpack.c.bf16 %v231_v4, %v227_v3  ;;  %v5602_v44 = vsub.f32 %v193_v15, %v229_v29  ;;  %v6306_v56 = vand.u32 4294901760, %v5562_v53 }
 0x477   :  { %4126 = vmatprep.subr.bf16.mxu0 %v5581_v25  ;;  %v5605_v51 = vpack.c.bf16 %v233_v17, %v229_v29  ;;  %v5607_v62 = vsub.f32 %v196_v34, %v233_v17  ;;  %v298_v30 = vsub.f32 %v5554_v28, %v6304_v14  ;;  %v310_v20 = vsub.f32 %v5556_v31, %v6303_v57 }
 0x478   :  { %6351 = vst [vmem:[#allocation40_spill] sm:$0xff] %v5598_v35  ;;  %v304_v4 = vsub.f32 %v5558_v37, %v6305_v8  ;;  %v316_v63 = vsub.f32 %v5562_v53, %v6306_v56  ;;  %v6312_v3 = vand.u32 4294901760, %v5566_v47  ;;  %v6315_v15 = vand.u32 4294901760, %v5569_v18 }
 0x479   :  { %6352 = vst [vmem:[#allocation41_spill] sm:$0xff] %v5605_v51  ;;  %4128 = vmatpush1.bf16.msra.mxu0 %v5585_v0  ;;  %v299_v34 = vand.u32 4294901760, %v298_v30  ;;  %v311_v29 = vand.u32 4294901760, %v310_v20  ;;  %v6316_v17 = vand.u32 4294901760, %v5575_v50  ;;  %v6320_v57 = vand.u32 4294901760, %v5577_v12 }
 0x47a   :  { %4130 = vmatprep.subr.bf16.mxu0 %v5598_v35  ;;  %v305_v14 = vand.u32 4294901760, %v304_v4  ;;  %v317_v8 = vand.u32 4294901760, %v316_v63  ;;  %v322_v56 = vsub.f32 %v5566_v47, %v6312_v3  ;;  %v334_v52 = vsub.f32 %v5569_v18, %v6315_v15 }
 0x47b   :  { %v4133_v24 = vpack.c.bf16 %v311_v29, %v299_v34  ;;  %v328_v30 = vsub.f32 %v5575_v50, %v6316_v17  ;;  %v340_v20 = vsub.f32 %v5577_v12, %v6320_v57  ;;  %v6317_v4 = vand.u32 4294901760, %v5579_v19 }
 0x47c   :  { %v4135_v63 = vpack.c.bf16 %v317_v8, %v305_v14  ;;  %v323_v27 = vand.u32 4294901760, %v322_v56  ;;  %v335_v35 = vand.u32 4294901760, %v334_v52  ;;  %v6318_v3 = vand.u32 4294901760, %v5583_v26 }
 0x47d   :  { %4132 = vmatpush1.bf16.msra.mxu0 %v5605_v51  ;;  %v329_v0 = vand.u32 4294901760, %v328_v30  ;;  %v341_v15 = vand.u32 4294901760, %v340_v20  ;;  %v346_v34 = vsub.f32 %v5579_v19, %v6317_v4  ;;  %v6319_v29 = vand.u32 4294901760, %v5587_v1 }
 0x47e   :  { %4134 = vmatprep.subr.bf16.mxu0 %v4133_v24  ;;  %v4137_v17 = vpack.c.bf16 %v335_v35, %v323_v27  ;;  %v358_v14 = vsub.f32 %v5583_v26, %v6318_v3  ;;  %v6321_v52 = vand.u32 4294901760, %v5589_v6  ;;  %v6324_v8 = vand.u32 4294901760, %v5591_v41 }
 0x47f   :  { %v347_v56 = vand.u32 4294901760, %v346_v34  ;;  %v352_v30 = vsub.f32 %v5587_v1, %v6319_v29  ;;  %v6326_v20 = vand.u32 4294901760, %v5600_v40  ;;  %v375_v35 = vand.u32 4294901760, %v5602_v44 }
 0x480   :  { %289 = vmatmul.mubr.f32.vlgmr.msra.gmra.mrb[0].mxu0 %v5206_v2  ;;  %v359_v4 = vand.u32 4294901760, %v358_v14  ;;  %v364_v27 = vsub.f32 %v5589_v6, %v6321_v52  ;;  %v370_v24 = vsub.f32 %v5591_v41, %v6324_v8  ;;  %v4139_v34 = vpack.c.bf16 %v341_v15, %v329_v0 }
 0x481   :  { %4136 = vmatpush1.bf16.msra.mxu0 %v4135_v63  ;;  %v353_v3 = vand.u32 4294901760, %v352_v30  ;;  %v382_v29 = vsub.f32 %v5600_v40, %v6326_v20  ;;  %v387_v2 = vand.u32 4294901760, %v5607_v62  ;;  %v6353_v14 = vmov 0.0  }
 0x482   :  { %439 = vmatprep.mubr.f32.mxu0 %v6353_v14  ;;  %4138 = vmatprep.subr.bf16.mxu0 %v4137_v17  ;;  %v4141_v57 = vpack.c.bf16 %v359_v4, %v347_v56  ;;  %v365_v52 = vand.u32 4294901760, %v364_v27  ;;  %v371_v51 = vand.u32 4294901760, %v370_v24  ;;  %v376_v8 = vsub.f32 %v5602_v44, %v375_v35 }
 0x483   :  { %v383_v23 = vand.u32 4294901760, %v382_v29  ;;  %v388_v0 = vsub.f32 %v5607_v62, %v387_v2 }
 0x484   :  { %v4143_v15 = vpack.c.bf16 %v365_v52, %v353_v3  ;;  %v377_v63 = vand.u32 4294901760, %v376_v8 }
 0x485   :  { %4140 = vmatpush1.bf16.msra.mxu0 %v4139_v34  ;;  %v389_v30 = vand.u32 4294901760, %v388_v0  ;;  %v4145_v20 = vpack.c.bf16 %v383_v23, %v371_v51  ;;  %v4153_v34 = vpack.c.bf16 %v5569_v18, %v5566_v47 }
 0x486   :  { %4142 = vmatprep.subr.bf16.mxu0 %v4141_v57 }
 0x487   :  { %v4147_v17 = vpack.c.bf16 %v389_v30, %v377_v63  ;;  %v4163_v30 = vpack.c.bf16 %v5607_v62, %v5602_v44  ;;  %v2433_v44 = vld [vmem:[#allocation15 + $0x10] sm:$0xff] }
 0x489   :  { %4144 = vmatpush1.bf16.msra.mxu0 %v4143_v15 }
 0x48a   :  { %4146 = vmatprep.subr.bf16.mxu0 %v4145_v20 }
 0x48d   :  { %4148 = vmatpush1.bf16.msra.mxu0 %v4147_v17 }
 0x490   :  { %441 = vmatmul.mubr.f32.vlgmr.msra.gmra.mrb[0].mxu0 %v5152_v38 }
 0x491   :  { %543 = vmatprep.mubr.f32.mxu0 %v6353_v14 }
 0x500   :  { %v2112_v4 = vpop.xlane.xlu0 %2111 }
 0x501   :  { %v2133_v29 = vrot.slane %v2112_v4, %v5226_v11  ;;  %v2117_v56 = vrot.slane %v2112_v4, %v5155_v39  ;;  %v2145_v27 = vrot.slane %v2112_v4, %v5353_v45  ;;  %v2121_v23 = vrot.slane %v2112_v4, %v5167_v43 }
 0x502   :  { %v2125_v52 = vrot.slane %v2112_v4, %v5194_v55  ;;  %v4149_v43 = vpack.c.bf16 %v5556_v31, %v5554_v28  ;;  %v2129_v55 = vrot.slane %v2112_v4, %v5212_v5  ;;  %v2137_v0 = vrot.slane %v2112_v4, %v5232_v22 }
 0x503   :  { %4588 = vrcp.f32 %v2133_v29  ;;  %v4155_v5 = vpack.c.bf16 %v5577_v12, %v5575_v50  ;;  %v4161_v22 = vpack.c.bf16 %v5600_v40, %v5591_v41 }
 0x504   :  { %4590 = vrcp.f32 %v2117_v56  ;;  %4150 = vmatprep.subr.bf16.mxu0 %v4149_v43  ;;  %v6355_v56 = vld [vmem:[#allocation39_spill] sm:$0xff] }
 0x505   :  { %4592 = vrcp.f32 %v2145_v27  ;;  %v6357_v27 = vld [vmem:[#allocation36_spill] sm:$0xff] }
 0x506   :  { %4594 = vrcp.f32 %v2121_v23 }
 0x507   :  { %4596 = vrcp.f32 %v2125_v52  ;;  %v6361_v52 = vand.u32 4294901760, %v5558_v37 }
 0x508   :  { %4598 = vrcp.f32 %v2129_v55  ;;  %v6367_v55 = vand.u32 4294901760, %v5575_v50  ;;  %v6374_v50 = vand.u32 4294901760, %v5591_v41  ;;  %v2431_v41 = vld [vmem:[#allocation15] sm:$0xff] }
 0x509   :  { %4600 = vrcp.f32 %v2137_v0  ;;  %v2466_v62 = vand.u32 4294901760, %v2431_v41 }
 0x50d   :  { %v4589_v57 = vpop.eup %4588 }
 0x50e   :  { %v4591_v51 = vpop.eup %4590  ;;  %v2167_v3 = vmul.f32 %v4589_v57, %v5500_v49  ;;  %v4151_v49 = vpack.c.bf16 %v5562_v53, %v5558_v37  ;;  %v6368_v37 = vand.u32 4294901760, %v5577_v12  ;;  %v6375_v12 = vand.u32 4294901760, %v5600_v40 }
 0x50f   :  { %v5682_v8 = vpop.eup %4592  ;;  %v2155_v11 = vmul.f32 %v4591_v51, %v5459_v54  ;;  %v2156_v45 = vmul.f32 %v4591_v51, %v5464_v48  ;;  %v6360_v51 = vand.u32 4294901760, %v5556_v31 }
 0x510   :  { %2219 = vperm.xlu0 %4522, %v2167_v3   ;;  %v2177_v39 = vmul.f32 %v5682_v8, %v5480_v7  ;;  %v4595_v20 = vpop.eup %4594  ;;  %4152 = vmatpush1.bf16.msra.mxu0 %v4151_v49  ;;  %v6364_v49 = vld [vmem:[#allocation32_spill] sm:$0xff] }
 0x511   :  { %2195 = vperm.xlu1 %4523, %v2155_v11   ;;  %v2158_v54 = vmul.f32 %v4595_v20, %v5468_v58  ;;  %v2159_v7 = vmul.f32 %v4595_v20, %v5475_v61  ;;  %v4597_v48 = vpop.eup %4596  ;;  %4154 = vmatprep.subr.bf16.mxu0 %v4153_v34  ;;  %v4157_v61 = vpack.c.bf16 %v5583_v26, %v5579_v19  ;;  %v6362_v11 = vand.u32 4294901760, %v5562_v53 }
 0x512   :  { %v2161_v24 = vmul.f32 %v4597_v48, %v5482_v59  ;;  %v2162_v15 = vmul.f32 %v4597_v48, %v5487_v9  ;;  %v4599_v58 = vpop.eup %4598  ;;  %v4159_v59 = vpack.c.bf16 %v5589_v6, %v5587_v1  ;;  %v2141_v9 = vrot.slane %v2112_v4, %v5238_v32 }
 0x513   :  { %v2164_v63 = vmul.f32 %v4599_v58, %v5492_v16  ;;  %v2165_v17 = vmul.f32 %v4599_v58, %v5496_v36  ;;  %v2168_v16 = vmul.f32 %v4589_v57, %v5470_v60  ;;  %v4601_v29 = vpop.eup %4600  ;;  %v6354_v36 = vld [vmem:[#allocation35_spill] sm:$0xff]  ;;  %v6358_v57 = vld [vmem:[#allocation41_spill] sm:$0xff]  ;;  %v6365_v20 = vand.u32 4294901760, %v5566_v47 }
 0x514   :  { %2240 = vperm.xlu0 %4522, %v2177_v39   ;;  %4156 = vmatpush1.bf16.msra.mxu0 %v4155_v5  ;;  %4602 = vrcp.f32 %v2141_v9  ;;  %v2170_v32 = vmul.f32 %v4601_v29, %v5505_v33  ;;  %v2171_v4 = vmul.f32 %v4601_v29, %v6354_v36  ;;  %v6359_v33 = vand.u32 4294901760, %v5554_v28  ;;  %v2440_v58 = vld [vmem:[#allocation15 + $0x48] sm:$0xff] }
 0x515   :  { %2198 = vperm.xlu1 %4523, %v2156_v45   ;;  %4158 = vmatprep.subr.bf16.mxu0 %v4157_v61  ;;  %v4183_v39 = vpack.c.bf16 %v6362_v11, %v6361_v52  ;;  %v6363_v45 = vld [vmem:[#allocation37_spill] sm:$0xff]  ;;  %v6366_v28 = vand.u32 4294901760, %v5569_v18  ;;  %v4187_v53 = vpack.c.bf16 %v6368_v37, %v6367_v55  ;;  %v6370_v48 = vand.u32 4294901760, %v5579_v19 }
 0x516   :  { %v4181_v3 = vpack.c.bf16 %v6360_v51, %v6359_v33  ;;  %v6372_v47 = vand.u32 4294901760, %v5587_v1  ;;  %v6373_v18 = vand.u32 4294901760, %v5589_v6  ;;  %v4195_v19 = vpack.c.bf16 %v387_v2, %v375_v35  ;;  %v2432_v1 = vld [vmem:[#allocation15 + $0x8] sm:$0xff]  ;;  %v2434_v6 = vld [vmem:[#allocation15 + $0x18] sm:$0xff]  ;;  %v2443_v33 = vld [vmem:[#allocation15 + $0x60] sm:$0xff] }
 0x517   :  { %v4185_v31 = vpack.c.bf16 %v6366_v28, %v6365_v20  ;;  %v2468_v40 = vand.u32 4294901760, %v2434_v6  ;;  %v2438_v35 = vld [vmem:[#allocation15 + $0x38] sm:$0xff]  ;;  %v2470_v2 = vand.u32 4294901760, %v2433_v44  ;;  %v5771_v61 = vsub.f32 %v2431_v41, %v2466_v62 }
 0x518   :  { %4160 = vmatpush1.bf16.msra.mxu0 %v4159_v59  ;;  %v4191_v0 = vpack.c.bf16 %v6373_v18, %v6372_v47  ;;  %v2439_v59 = vld [vmem:[#allocation15 + $0x40] sm:$0xff]  ;;  %v2480_v36 = vand.u32 4294901760, %v2440_v58  ;;  %v2490_v55 = vand.u32 4294901760, %v2443_v33 }
 0x519   :  { %2201 = vperm.xlu1 %4523, %v2158_v54   ;;  %4162 = vmatprep.subr.bf16.mxu0 %v4161_v22  ;;  %v6369_v54 = vld [vmem:[#allocation38_spill] sm:$0xff]  ;;  %v5778_v9 = vsub.f32 %v2433_v44, %v2470_v2 }
 0x51a   :  { %v5791_v52 = vsub.f32 %v2440_v58, %v2480_v36 }
 0x51c   :  { %4164 = vmatpush1.bf16.msra.mxu0 %v4163_v30 }
 0x51d   :  { %2204 = vperm.xlu1 %4523, %v2159_v7   ;;  %4166 = vmatprep.subr.bf16.mxu0 %v5552_v13  ;;  %v2176_v7 = vmul.f32 %v5682_v8, %v6369_v54  ;;  %v4193_v8 = vpack.c.bf16 %v6375_v12, %v6374_v50  ;;  %v2564_v50 = vand.u32 4294901760, %v5771_v61  ;;  %v2576_v12 = vand.u32 4294901760, %v5778_v9 }
 0x51e   :  { %v4603_v60 = vpop.eup %4602 }
 0x51f   :  { %546 = vmatmul.mubr.f32.vlgmr.msra.gmra.mrb[0].mxu0 %v5175_v46  ;;  %v6356_v46 = vld [vmem:[#allocation40_spill] sm:$0xff]  ;;  %v2173_v23 = vmul.f32 %v4603_v60, %v6357_v27  ;;  %v2174_v43 = vmul.f32 %v4603_v60, %v6363_v45  ;;  %v2565_v41 = vsub.f32 %v5771_v61, %v2564_v50 }
 0x520   :  { %4168 = vmatpush1.bf16.msra.mxu0 %v5560_v10  ;;  %632 = vmatprep.mubr.f32.mxu0 %v6353_v14 }
 0x521   :  { %2207 = vperm.xlu1 %4523, %v2161_v24   ;;  %4170 = vmatprep.subr.bf16.mxu0 %v5564_v21  ;;  %v6371_v24 = vand.u32 4294901760, %v5583_v26  ;;  %v2464_v26 = vand.u32 4294901760, %v2432_v1 }
 0x523   :  { %v4189_v34 = vpack.c.bf16 %v6371_v24, %v6370_v48  ;;  %v5776_v22 = vsub.f32 %v2432_v1, %v2464_v26 }
 0x524   :  { %4172 = vmatpush1.bf16.msra.mxu0 %v5573_v42 }
 0x525   :  { %2210 = vperm.xlu1 %4523, %v2162_v15   ;;  %4174 = vmatprep.subr.bf16.mxu0 %v5581_v25  ;;  %v2437_v15 = vld [vmem:[#allocation15 + $0x30] sm:$0xff] }
 0x528   :  { %4176 = vmatpush1.bf16.msra.mxu0 %v6355_v56 }
 0x529   :  { %2213 = vperm.xlu1 %4523, %v2164_v63   ;;  %4178 = vmatprep.subr.bf16.mxu0 %v6356_v46  ;;  %v2441_v63 = vld [vmem:[#allocation15 + $0x50] sm:$0xff] }
 0x52a   :  { %v2486_v27 = vand.u32 4294901760, %v2441_v63 }
 0x52c   :  { %4180 = vmatpush1.bf16.msra.mxu0 %v6358_v57  ;;  %v5803_v20 = vsub.f32 %v2441_v63, %v2486_v27 }
 0x52d   :  { %2216 = vperm.xlu1 %4523, %v2165_v17   ;;  %4182 = vmatprep.subr.bf16.mxu0 %v4181_v3  ;;  %v2444_v17 = vld [vmem:[#allocation15 + $0x68] sm:$0xff] }
 0x52e   :  { %v2488_v11 = vand.u32 4294901760, %v2444_v17 }
 0x52f   :  { %636 = vmatmul.mubr.f32.vlgmr.msra.gmra.mrb[0].mxu0 %v6364_v49 }
 0x530   :  { %4184 = vmatpush1.bf16.msra.mxu0 %v4183_v39  ;;  %754 = vmatprep.mubr.f32.mxu0 %v6353_v14  ;;  %v5794_v39 = vpack.c.bf16 %v2470_v2, %v2466_v62 }
 0x531   :  { %2222 = vperm.xlu1 %4523, %v2168_v16   ;;  %4186 = vmatprep.subr.bf16.mxu0 %v4185_v31  ;;  %v5805_v31 = vsub.f32 %v2444_v17, %v2488_v11 }
 0x532   :  { %6377 = vst [vmem:[#allocation39_spill] sm:$0xff] %v5794_v39 }
 0x534   :  { %4188 = vmatpush1.bf16.msra.mxu0 %v4187_v53  ;;  %v2558_v53 = vand.u32 4294901760, %v5776_v22 }
 0x535   :  { %2225 = vperm.xlu1 %4523, %v2170_v32   ;;  %4190 = vmatprep.subr.bf16.mxu0 %v4189_v34  ;;  %v2478_v32 = vand.u32 4294901760, %v2437_v15 }
 0x536   :  { %v2559_v34 = vsub.f32 %v5776_v22, %v2558_v53 }
 0x537   :  { %v5789_v3 = vsub.f32 %v2437_v15, %v2478_v32 }
 0x538   :  { %4192 = vmatpush1.bf16.msra.mxu0 %v4191_v0  ;;  %v2560_v0 = vand.u32 4294901760, %v2559_v34 }
 0x539   :  { %2228 = vperm.xlu1 %4523, %v2171_v4   ;;  %4194 = vmatprep.subr.bf16.mxu0 %v4193_v8  ;;  %v5785_v4 = vsub.f32 %v2434_v6, %v2468_v40  ;;  %v2600_v44 = vand.u32 4294901760, %v5789_v3 }
 0x53b   :  { %v2601_v58 = vsub.f32 %v5789_v3, %v2600_v44 }
 0x53c   :  { %4196 = vmatpush1.bf16.msra.mxu0 %v4195_v19 }
 0x53d   :  { %2231 = vperm.xlu1 %4523, %v2173_v23   ;;  %4198 = vmatprep.subr.bf16.mxu0 %v5552_v13  ;;  %v2436_v13 = vld [vmem:[#allocation15 + $0x28] sm:$0xff]  ;;  %v2446_v23 = vld [vmem:[#allocation15 + $0x78] sm:$0xff] }
 0x53e   :  { %v2472_v5 = vand.u32 4294901760, %v2436_v13  ;;  %v2492_v28 = vand.u32 4294901760, %v2446_v23 }
 0x53f   :  { %756 = vmatmul.mubr.f32.vlgmr.msra.gmra.mrb[0].mxu0 %v5152_v38 }
 0x540   :  { %4200 = vmatpush1.bf16.msra.mxu0 %v5560_v10  ;;  %842 = vmatprep.mubr.f32.mxu0 %v6353_v14  ;;  %v2435_v10 = vld [vmem:[#allocation15 + $0x20] sm:$0xff]  ;;  %v5780_v30 = vsub.f32 %v2436_v13, %v2472_v5  ;;  %v5810_v54 = vsub.f32 %v2446_v23, %v2492_v28  ;;  %v5833_v8 = vpack.c.bf16 %v2492_v28, %v2488_v11  ;;  %v2624_v23 = vand.u32 4294901760, %v5803_v20 }
 0x541   :  { %2234 = vperm.xlu1 %4523, %v2174_v43   ;;  %4202 = vmatprep.subr.bf16.mxu0 %v5564_v21  ;;  %v2476_v21 = vand.u32 4294901760, %v2438_v35  ;;  %v2474_v29 = vand.u32 4294901760, %v2435_v10 }
 0x542   :  { %6382 = vst [vmem:[#allocation32_spill] sm:$0xff] %v5833_v8  ;;  %v2582_v1 = vand.u32 4294901760, %v5780_v30 }
 0x543   :  { %v5783_v16 = vsub.f32 %v2438_v35, %v2476_v21  ;;  %v5787_v51 = vsub.f32 %v2435_v10, %v2474_v29  ;;  %v5796_v45 = vpack.c.bf16 %v2476_v21, %v2472_v5  ;;  %v5815_v48 = vpack.c.bf16 %v2478_v32, %v2474_v29 }
 0x544   :  { %4204 = vmatpush1.bf16.msra.mxu0 %v5573_v42  ;;  %v2442_v42 = vld [vmem:[#allocation15 + $0x58] sm:$0xff]  ;;  %v2583_v35 = vsub.f32 %v5780_v30, %v2582_v1  ;;  %v2566_v5 = vand.u32 4294901760, %v2565_v41  ;;  %v2602_v32 = vand.u32 4294901760, %v2601_v58 }
 0x545   :  { %2237 = vperm.xlu1 %4523, %v2176_v7   ;;  %4206 = vmatprep.subr.bf16.mxu0 %v5581_v25  ;;  %v5774_v25 = vpack.c.bf16 %v2468_v40, %v2464_v26  ;;  %v2484_v60 = vand.u32 4294901760, %v2442_v42  ;;  %6378 = vst [vmem:[#allocation40_spill] sm:$0xff] %v5796_v45  ;;  %v5812_v7 = vsub.f32 %v2443_v33, %v2490_v55  ;;  %6379 = vst [vmem:[#allocation36_spill] sm:$0xff] %v5815_v48 }
 0x546   :  { %v2594_v6 = vand.u32 4294901760, %v5783_v16  ;;  %v2577_v26 = vsub.f32 %v5778_v9, %v2576_v12  ;;  %v2588_v40 = vand.u32 4294901760, %v5787_v51  ;;  %v2584_v21 = vand.u32 4294901760, %v2583_v35 }
 0x547   :  { %6376 = vst [vmem:[#allocation35_spill] sm:$0xff] %v5774_v25  ;;  %v5798_v43 = vsub.f32 %v2442_v42, %v2484_v60  ;;  %v5824_v47 = vpack.c.bf16 %v2484_v60, %v2480_v36 }
 0x548   :  { %4208 = vmatpush1.bf16.msra.mxu0 %v6355_v56  ;;  %v2482_v56 = vand.u32 4294901760, %v2439_v59  ;;  %v2595_v2 = vsub.f32 %v5783_v16, %v2594_v6  ;;  %v2578_v10 = vand.u32 4294901760, %v2577_v26  ;;  %v2589_v15 = vsub.f32 %v5787_v51, %v2588_v40 }
 0x549   :  { %4210 = vmatprep.subr.bf16.mxu0 %v6356_v46  ;;  %v2445_v46 = vld [vmem:[#allocation15 + $0x70] sm:$0xff]  ;;  %6380 = vst [vmem:[#allocation41_spill] sm:$0xff] %v5824_v47  ;;  %v2618_v63 = vand.u32 4294901760, %v5798_v43 }
 0x54a   :  { %v5800_v49 = vsub.f32 %v2439_v59, %v2482_v56  ;;  %v2494_v37 = vand.u32 4294901760, %v2445_v46  ;;  %v5829_v18 = vpack.c.bf16 %v2486_v27, %v2482_v56  ;;  %v2596_v42 = vand.u32 4294901760, %v2595_v2 }
 0x54b   :  { %v2606_v59 = vand.u32 4294901760, %v5791_v52  ;;  %v5862_v17 = vpack.c.bf16 %v2578_v10, %v2566_v5  ;;  %v2590_v29 = vand.u32 4294901760, %v2589_v15  ;;  %v2619_v27 = vsub.f32 %v5798_v43, %v2618_v63 }
 0x54c   :  { %4212 = vmatpush1.bf16.msra.mxu0 %v6358_v57  ;;  %v2570_v57 = vand.u32 4294901760, %v5785_v4  ;;  %v5817_v24 = vsub.f32 %v2445_v46, %v2494_v37  ;;  %6381 = vst [vmem:[#allocation37_spill] sm:$0xff] %v5829_v18  ;;  %v5847_v62 = vpack.c.bf16 %v2494_v37, %v2490_v55  ;;  %v2612_v36 = vand.u32 4294901760, %v5800_v49 }
 0x54d   :  { %4286 = vmatprep.subr.bf16.mxu0 %v5774_v25  ;;  %v5866_v60 = vpack.c.bf16 %v2596_v42, %v2584_v21  ;;  %v2607_v56 = vsub.f32 %v5791_v52, %v2606_v59  ;;  %v5871_v33 = vpack.c.bf16 %v2602_v32, %v2590_v29  ;;  %v2620_v28 = vand.u32 4294901760, %v2619_v27 }
 0x54e   :  { %6383 = vst [vmem:[#allocation38_spill] sm:$0xff] %v5847_v62  ;;  %v2613_v11 = vsub.f32 %v5800_v49, %v2612_v36  ;;  %v2625_v55 = vsub.f32 %v5803_v20, %v2624_v23  ;;  %v2630_v37 = vand.u32 4294901760, %v5805_v31 }
 0x54f   :  { %844 = vmatmul.mubr.f32.vlgmr.msra.gmra.mrb[0].mxu0 %v5152_v38  ;;  %v2571_v38 = vsub.f32 %v5785_v4, %v2570_v57  ;;  %v2608_v46 = vand.u32 4294901760, %v2607_v56  ;;  %v154_v56 = vld [vmem:[#allocation10 + $0x30] sm:$0xff] }
 0x550   :  { %4288 = vmatpush1.bf16.msra.mxu0 %v5794_v39  ;;  %2544 = vmatprep.mubr.f32.mxu0 %v6353_v14  ;;  %v2614_v34 = vand.u32 4294901760, %v2613_v11  ;;  %v2626_v26 = vand.u32 4294901760, %v2625_v55  ;;  %v2631_v35 = vsub.f32 %v5805_v31, %v2630_v37  ;;  %v152_v55 = vld [vmem:[#allocation10 + $0x20] sm:$0xff] }
 0x551   :  { %4290 = vmatprep.subr.bf16.mxu0 %v5796_v45  ;;  %v2572_v19 = vand.u32 4294901760, %v2571_v38  ;;  %v2642_v38 = vand.u32 4294901760, %v5810_v54  ;;  %v5880_v41 = vpack.c.bf16 %v2620_v28, %v2608_v46  ;;  %v155_v46 = vld [vmem:[#allocation10 + $0x38] sm:$0xff] }
 0x552   :  { %v5886_v15 = vpack.c.bf16 %v2626_v26, %v2614_v34  ;;  %v2632_v58 = vand.u32 4294901760, %v2631_v35  ;;  %v148_v34 = vld [vmem:[#allocation10] sm:$0xff] }
 0x553   :  { %v4301_v13 = vpack.c.bf16 %v2572_v19, %v2560_v0  ;;  %v2636_v0 = vand.u32 4294901760, %v5812_v7  ;;  %v2648_v19 = vand.u32 4294901760, %v5817_v24  ;;  %v2643_v2 = vsub.f32 %v5810_v54, %v2642_v38 }
 0x554   :  { %4292 = vmatpush1.bf16.msra.mxu0 %v5815_v48  ;;  %v160_v48 = vld [vmem:[#allocation10 + $0x60] sm:$0xff] }
 0x555   :  { %4294 = vmatprep.subr.bf16.mxu0 %v5824_v47  ;;  %v2637_v5 = vsub.f32 %v5812_v7, %v2636_v0  ;;  %v2649_v10 = vsub.f32 %v5817_v24, %v2648_v19  ;;  %v2644_v21 = vand.u32 4294901760, %v2643_v2  ;;  %v5914_v2 = vpack.c.bf16 %v2570_v57, %v2558_v53 }
 0x556   :  { %v5934_v53 = vpack.c.bf16 %v2618_v63, %v2606_v59  ;;  %v150_v63 = vld [vmem:[#allocation10 + $0x10] sm:$0xff] }
 0x557   :  { %v2638_v42 = vand.u32 4294901760, %v2637_v5  ;;  %v2650_v29 = vand.u32 4294901760, %v2649_v10  ;;  %v5888_v32 = vpack.c.bf16 %v2644_v21, %v2632_v58  ;;  %6384 = vst [vmem:[#allocation42_spill] sm:$0xff] %v5914_v2  ;;  %v5920_v5 = vpack.c.bf16 %v2576_v12, %v2564_v50 }
 0x558   :  { %4296 = vmatpush1.bf16.msra.mxu0 %v5829_v18  ;;  %v5926_v10 = vpack.c.bf16 %v2594_v6, %v2582_v1  ;;  %v5932_v21 = vpack.c.bf16 %v2600_v44, %v2588_v40  ;;  %6388 = vst [vmem:[#allocation46_spill] sm:$0xff] %v5934_v53  ;;  %v5940_v50 = vpack.c.bf16 %v2642_v38, %v2630_v37  ;;  %v149_v6 = vld [vmem:[#allocation10 + $0x8] sm:$0xff]  ;;  %v151_v44 = vld [vmem:[#allocation10 + $0x18] sm:$0xff] }
 0x559   :  { %4298 = vmatprep.subr.bf16.mxu0 %v5833_v8  ;;  %6385 = vst [vmem:[#allocation43_spill] sm:$0xff] %v5920_v5  ;;  %v153_v38 = vld [vmem:[#allocation10 + $0x28] sm:$0xff] }
 0x55a   :  { %6386 = vst [vmem:[#allocation44_spill] sm:$0xff] %v5926_v10  ;;  %6387 = vst [vmem:[#allocation45_spill] sm:$0xff] %v5932_v21 }
 0x55b   :  { %6390 = vst [vmem:[#allocation48_spill] sm:$0xff] %v5940_v50 }
 0x55c   :  { %4300 = vmatpush1.bf16.msra.mxu0 %v5847_v62 }
 0x55d   :  { %4302 = vmatprep.subr.bf16.mxu0 %v4301_v13  ;;  %v5890_v13 = vpack.c.bf16 %v2650_v29, %v2638_v42  ;;  %v5938_v42 = vpack.c.bf16 %v2624_v23, %v2612_v36  ;;  %v5944_v29 = vpack.c.bf16 %v2648_v19, %v2636_v0 }
 0x55f   :  { %6389 = vst [vmem:[#allocation47_spill] sm:$0xff] %v5938_v42  ;;  %6391 = vst [vmem:[#allocation49_spill] sm:$0xff] %v5944_v29  ;;  %v156_v29 = vld [vmem:[#allocation10 + $0x40] sm:$0xff] }
 0x590   :  { %v5908_v35 = vpop.permute.xlu1 %2195 }
 0x591   :  { %v2339_v59 = vmul.f32 %v5908_v35, %v148_v34 }
 0x593   :  { %v2355_v19 = vsel %vm169_vm1, %v2339_v59, 0.0 }
 0x594   :  { %v5928_v58 = vpop.permute.xlu1 %2198 }
 0x595   :  { %v2340_v40 = vmul.f32 %v5928_v58, %v149_v6  ;;  %v5960_v6 = vpop.permute.xlu0 %2219 }
 0x597   :  { %v2356_v37 = vsel %vm169_vm1, %v2340_v40, 0.0 }
 0x598   :  { %v5936_v57 = vpop.permute.xlu1 %2201  ;;  %v2357_v11 = vadd.f32 %v2356_v37, %v2355_v19  ;;  %v171_v19 = vld [vmem:[#allocation9] sm:$0xff] }
 0x599   :  { %v2341_v0 = vmul.f32 %v5936_v57, %v150_v63  ;;  %v5973_v10 = vpop.permute.xlu0 %2240  ;;  %172 = vst.msk [vmem:[#allocation3] sm:$0xff] %vm169_vm1, %v171_v19  ;;  %v6392_v19 = vld [vmem:[#allocation33_spill] sm:$0xff] }
 0x59a   :  { %v2358_v53 = vrot.slane %v2357_v11, 4 }
 0x59b   :  { %v2364_v40 = vsel %vm169_vm1, %v2341_v0, 0.0  ;;  %v163_v0 = vld [vmem:[#allocation10 + $0x78] sm:$0xff] }
 0x59c   :  { %v5942_v12 = vpop.permute.xlu1 %2204  ;;  %v2354_v62 = vmul.f32 %v5973_v10, %v163_v0 }
 0x59d   :  { %v2342_v23 = vmul.f32 %v5942_v12, %v151_v44  ;;  %v157_v44 = vld [vmem:[#allocation10 + $0x48] sm:$0xff] }
 0x59f   :  { %v2365_v34 = vsel %vm169_vm1, %v2342_v23, 0.0 }
 0x5a0   :  { %v5946_v1 = vpop.permute.xlu1 %2207  ;;  %v2366_v50 = vadd.f32 %v2365_v34, %v2364_v40 }
 0x5a1   :  { %v2343_v63 = vmul.f32 %v5946_v1, %v152_v55 }
 0x5a2   :  { %v2367_v34 = vrot.slane %v2366_v50, 4 }
 0x5a3   :  { %v2373_v55 = vsel %vm169_vm1, %v2343_v63, 0.0  ;;  %v159_v63 = vld [vmem:[#allocation10 + $0x58] sm:$0xff] }
 0x5a4   :  { %v5948_v26 = vpop.permute.xlu1 %2210 }
 0x5a5   :  { %v2344_v27 = vmul.f32 %v5948_v26, %v153_v38  ;;  %v2347_v38 = vmul.f32 %v5960_v6, %v156_v29 }
 0x5a7   :  { %v2374_v21 = vsel %vm169_vm1, %v2344_v27, 0.0  ;;  %v2391_v2 = vsel %vm169_vm1, %v2347_v38, 0.0 }
 0x5a8   :  { %v5952_v36 = vpop.permute.xlu1 %2213  ;;  %v2375_v40 = vadd.f32 %v2374_v21, %v2373_v55  ;;  %v2281_v21 = vrot.slane %v5960_v6, %v6392_v19  ;;  %v2368_v55 = vadd.f32 %v2367_v34, %v2366_v50  ;;  %v174_v6 = vld [vmem:[#allocation3] sm:$0xff]  ;;  %v2254_v34 = vrot.slane %v5936_v57, %v6392_v19 }
 0x5a9   :  { %v2345_v37 = vmul.f32 %v5952_v36, %v154_v56  ;;  %v158_v56 = vld [vmem:[#allocation10 + $0x50] sm:$0xff]  ;;  %3127 = vrot.lane.b32.xlu1 %v174_v6, %s4919_s9 }
 0x5aa   :  { %v2376_v47 = vrot.slane %v2375_v40, 4 }
 0x5ab   :  { %v2382_v29 = vsel %vm169_vm1, %v2345_v37, 0.0 }
 0x5ac   :  { %v5958_v28 = vpop.permute.xlu1 %2216 }
 0x5ad   :  { %v2346_v59 = vmul.f32 %v5958_v28, %v155_v46 }
 0x5af   :  { %v2383_v46 = vsel %vm169_vm1, %v2346_v59, 0.0 }
 0x5b0   :  { %v5967_v42 = vpop.permute.xlu1 %2222  ;;  %v2384_v8 = vadd.f32 %v2383_v46, %v2382_v29  ;;  %v2369_v29 = vrot.slane %v2368_v55, 2 }
 0x5b1   :  { %v2348_v23 = vmul.f32 %v5967_v42, %v157_v44  ;;  %v2359_v44 = vadd.f32 %v2358_v53, %v2357_v11  ;;  %v6393_v53 = vld [vmem:[#allocation34_spill] sm:$0xff] }
 0x5b2   :  { %v2249_v37 = vrot.slane %v5928_v58, %v6393_v53  ;;  %v2258_v0 = vrot.slane %v5942_v12, %v6393_v53  ;;  %v2385_v50 = vrot.slane %v2384_v8, 4  ;;  %v2285_v25 = vrot.slane %v5967_v42, %v6393_v53 }
 0x5b3   :  { %v2392_v27 = vsel %vm169_vm1, %v2348_v23, 0.0  ;;  %v2245_v23 = vrot.slane %v5908_v35, %v6392_v19  ;;  %v2360_v38 = vrot.slane %v2359_v44, 2  ;;  %v2267_v35 = vrot.slane %v5948_v26, %v6393_v53 }
 0x5b4   :  { %v5979_v5 = vpop.permute.xlu1 %2225  ;;  %v2393_v18 = vadd.f32 %v2392_v27, %v2391_v2  ;;  %v5996_v27 = vsel %vm169_vm1, %v2354_v62, 0.0  ;;  %v2263_v62 = vrot.slane %v5946_v1, %v6392_v19  ;;  %v2259_v57 = vsel %vm1793_vm2, %v2258_v0, %v2254_v34 }
 0x5b5   :  { %v2349_v59 = vmul.f32 %v5979_v5, %v158_v56  ;;  %v2250_v45 = vsel %vm1793_vm2, %v2249_v37, %v2245_v23  ;;  %v6008_v39 = vadd.f32 %v2360_v38, %v2359_v44  ;;  %v2386_v6 = vadd.f32 %v2385_v50, %v2384_v8 }
 0x5b6   :  { %v2394_v58 = vrot.slane %v2393_v18, 4  ;;  %v2314_v37 = vsel %vm1858_vm3, %v2259_v57, %v2250_v45  ;;  %v2370_v38 = vadd.f32 %v2369_v29, %v2368_v55  ;;  %v2290_v42 = vrot.slane %v5979_v5, %v6392_v19  ;;  %v162_v45 = vld [vmem:[#allocation10 + $0x70] sm:$0xff] }
 0x5b7   :  { %v2400_v56 = vsel %vm169_vm1, %v2349_v59, 0.0  ;;  %v2276_v59 = vrot.slane %v5958_v28, %v6393_v53 }
 0x5b8   :  { %v2229_v11 = vpop.permute.xlu1 %2228 }
 0x5b9   :  { %v2350_v46 = vmul.f32 %v2229_v11, %v159_v63  ;;  %v2377_v63 = vadd.f32 %v2376_v47, %v2375_v40  ;;  %v161_v47 = vld [vmem:[#allocation10 + $0x68] sm:$0xff]  ;;  %v2272_v40 = vrot.slane %v5952_v36, %v6392_v19  ;;  %v2294_v44 = vrot.slane %v2229_v11, %v6393_v53 }
 0x5ba   :  { %v2286_v11 = vsel %vm1793_vm2, %v2285_v25, %v2281_v21 }
 0x5bb   :  { %v2401_v12 = vsel %vm169_vm1, %v2350_v46, 0.0  ;;  %v2268_v46 = vsel %vm1793_vm2, %v2267_v35, %v2263_v62  ;;  %v2378_v0 = vrot.slane %v2377_v63, 2  ;;  %v2277_v8 = vsel %vm1793_vm2, %v2276_v59, %v2272_v40 }
 0x5bc   :  { %v2402_v2 = vadd.f32 %v2401_v12, %v2400_v56  ;;  %v2232_v26 = vpop.permute.xlu1 %2231  ;;  %v2395_v56 = vadd.f32 %v2394_v58, %v2393_v18  ;;  %v2315_v36 = vsel %vm1860_vm4, %v2268_v46, %v2314_v37  ;;  %v2387_v18 = vrot.slane %v2386_v6, 2 }
 0x5bd   :  { %v2351_v23 = vmul.f32 %v2232_v26, %v160_v48  ;;  %v2299_v48 = vrot.slane %v2232_v26, %v6392_v19  ;;  %v2316_v5 = vsel %vm1862_vm5, %v2277_v8, %v2315_v36  ;;  %v2379_v46 = vadd.f32 %v2378_v0, %v2377_v63 }
 0x5be   :  { %v2403_v1 = vrot.slane %v2402_v2, 4  ;;  %v2396_v55 = vrot.slane %v2395_v56, 2  ;;  %v2317_v25 = vsel %vm1864_vm6, %v2286_v11, %v2316_v5 }
 0x5bf   :  { %v2409_v58 = vsel %vm169_vm1, %v2351_v23, 0.0 }
 0x5c0   :  { %v2404_v28 = vadd.f32 %v2403_v1, %v2402_v2  ;;  %v2235_v34 = vpop.permute.xlu1 %2234  ;;  %v2295_v2 = vsel %vm1793_vm2, %v2294_v44, %v2290_v42  ;;  %v2371_v1 = vrot.slane %v2370_v38, 1  ;;  %v2397_v23 = vadd.f32 %v2396_v55, %v2395_v56 }
 0x5c1   :  { %v2303_v35 = vrot.slane %v2235_v34, %v6393_v53  ;;  %v2352_v50 = vmul.f32 %v2235_v34, %v161_v47  ;;  %v2388_v47 = vadd.f32 %v2387_v18, %v2386_v6  ;;  %v2318_v44 = vsel %vm1866_vm7, %v2295_v2, %v2317_v25 }
 0x5c2   :  { %v2405_v29 = vrot.slane %v2404_v28, 2  ;;  %v6394_v34 = vrot.slane %v5973_v10, %v6393_v53  ;;  %v2380_v6 = vrot.slane %v2379_v46, 1  ;;  %v2362_v56 = vrot.slane %v6008_v39, 1 }
 0x5c3   :  { %v2410_v12 = vsel %vm169_vm1, %v2352_v50, 0.0  ;;  %v2304_v62 = vsel %vm1793_vm2, %v2303_v35, %v2299_v48  ;;  %v2389_v50 = vrot.slane %v2388_v47, 1  ;;  %v2398_v11 = vrot.slane %v2397_v23, 1 }
 0x5c4   :  { %v2411_v57 = vadd.f32 %v2410_v12, %v2409_v58  ;;  %v2238_v59 = vpop.permute.xlu1 %2237  ;;  %v2319_v63 = vsel %vm1868_vm8, %v2304_v62, %v2318_v44  ;;  %v2406_v0 = vadd.f32 %v2405_v29, %v2404_v28  ;;  %v2372_v10 = vadd.f32 %v2371_v1, %v2370_v38 }
 0x5c5   :  { %v2308_v21 = vrot.slane %v2238_v59, %v6392_v19  ;;  %v2353_v26 = vmul.f32 %v2238_v59, %v162_v45  ;;  %v2381_v55 = vadd.f32 %v2380_v6, %v2379_v46  ;;  %v2363_v28 = vadd.f32 %v2362_v56, %v6008_v39  ;;  %v2428_v6 = vld [vmem:[#allocation4 + $0x8] sm:$0xff] }
 0x5c6   :  { %v2412_v40 = vrot.slane %v2411_v57, 4  ;;  %v2407_v53 = vrot.slane %v2406_v0, 1  ;;  %v2390_v2 = vadd.f32 %v2389_v50, %v2388_v47  ;;  %v2399_v12 = vadd.f32 %v2398_v11, %v2397_v23 }
 0x5c7   :  { %v2418_v37 = vsel %vm169_vm1, %v2353_v26, 0.0  ;;  %v2313_v8 = vsel %vm1793_vm2, %v6394_v34, %v2308_v21  ;;  %v2455_v5 = vsel %vm1858_vm3, %v2372_v10, %v2363_v28 }
 0x5c8   :  { %v2413_v42 = vadd.f32 %v2412_v40, %v2411_v57  ;;  %v2420_v19 = vadd.f32 %v5996_v27, %v2418_v37  ;;  %v2320_v35 = vsel %vm1870_vm9, %v2313_v8, %v2319_v63  ;;  %v2408_v29 = vadd.f32 %v2407_v53, %v2406_v0  ;;  %v2427_v63 = vld [vmem:[#allocation4] sm:$0xff] }
 0x5c9   :  { %2322 = vst.msk [vmem:[#allocation19] sm:$0xff] %vm1873_vm10, %v2320_v35  ;;  %v2456_v57 = vsel %vm1860_vm4, %v2381_v55, %v2455_v5  ;;  %v6395_v8 = vpack.c.bf16 %v5785_v4, %v5776_v22  ;;  %v6400_v22 = vpack.c.bf16 %v5803_v20, %v5800_v49  ;;  %v6405_v4 = vld [vmem:[#allocation40_spill] sm:$0xff]  ;;  %v6410_v49 = vld [vmem:[#allocation38_spill] sm:$0xff] }
 0x5ca   :  { %v2414_v36 = vrot.slane %v2413_v42, 2  ;;  %v2421_v18 = vrot.slane %v2420_v19, 4  ;;  %v2457_v25 = vsel %vm1862_vm5, %v2390_v2, %v2456_v57  ;;  %v6411_v20 = vld [vmem:[#allocation42_spill] sm:$0xff]  ;;  %v3151_v53 = vld [vmem:[#allocation16] sm:$0xff]  ;;  %v3154_v2 = vld [vmem:[#allocation16 + $0x18] sm:$0xff] }
 0x5cb   :  { %v2458_v21 = vsel %vm1864_vm6, %v2399_v12, %v2457_v25  ;;  %v3169_v55 = vand.u32 4294901760, %v3151_v53  ;;  %v6419_v25 = vmov 0.0|0.0  }
 0x5cc   :  { %v2415_v48 = vadd.f32 %v2414_v36, %v2413_v42  ;;  %v2422_v45 = vadd.f32 %v2421_v18, %v2420_v19  ;;  %v2459_v46 = vsel %vm1866_vm7, %v2408_v29, %v2458_v21 }
 0x5cd   :  { %v6117_v5 = vsub.f32 %v3151_v53, %v3169_v55 }
 0x5ce   :  { %v2416_v27 = vrot.slane %v2415_v48, 1  ;;  %v2423_v58 = vrot.slane %v2422_v45, 2 }
 0x5d0   :  { %v2424_v62 = vadd.f32 %v2423_v58, %v2422_v45  ;;  %v2417_v59 = vadd.f32 %v2416_v27, %v2415_v48  ;;  %v3152_v48 = vld [vmem:[#allocation16 + $0x8] sm:$0xff]  ;;  %v3153_v45 = vld [vmem:[#allocation16 + $0x10] sm:$0xff]  ;;  %v3178_v58 = vand.u32 4294901760, %v3154_v2 }
 0x5d1   :  { %v3172_v28 = vand.u32 4294901760, %v3152_v48  ;;  %v3175_v27 = vand.u32 4294901760, %v3153_v45 }
 0x5d2   :  { %v2425_v38 = vrot.slane %v2424_v62, 1  ;;  %v2460_v39 = vsel %vm1868_vm8, %v2417_v59, %v2459_v46  ;;  %v6123_v57 = vsub.f32 %v3154_v2, %v3178_v58 }
 0x5d3   :  { %v6115_v12 = vpack.c.bf16 %v3172_v28, %v3169_v55  ;;  %v6119_v29 = vsub.f32 %v3152_v48, %v3172_v28  ;;  %v6126_v59 = vpack.c.bf16 %v3178_v58, %v3175_v27 }
 0x5d4   :  { %v2426_v26 = vadd.f32 %v2425_v38, %v2424_v62  ;;  %v6121_v62 = vsub.f32 %v3153_v45, %v3175_v27 }
 0x5d5   :  { %4383 = vmatpush3.bf16.msra.mxu1 %v6115_v12  ;;  %v4406_v28 = vpack.c.bf16 %v6119_v29, %v6117_v5 }
 0x5d6   :  { %v2461_v1 = vsel %vm1870_vm9, %v2426_v26, %v2460_v39  ;;  %4384 = vmatprep.subr.bf16.mxu1 %v6419_v25  ;;  %v4409_v2 = vpack.c.bf16 %v6123_v57, %v6121_v62 }
 0x5d7   :  { %v2462_v47 = vsel %vm169_vm1, %v2461_v1, 0 }
 0x5d8   :  { %v2545_v40 = vand.u32 4294901760, %v2462_v47 }
 0x5d9   :  { %4386 = vmatpush3.bf16.msra.mxu1 %v6126_v59 }
 0x5da   :  { %v2546_v44 = vsub.f32 %v2462_v47, %v2545_v40  ;;  %4387 = vmatprep.subr.bf16.mxu1 %v6419_v25 }
 0x5dc   :  { %v2547_v23 = vand.u32 4294901760, %v2546_v44 }
 0x5de   :  { %v2548_v37 = vsub.f32 %v2546_v44, %v2547_v23 }
 0x5e0   :  { %v2549_v34 = vand.u32 4294901760, %v2548_v37 }
 0x5e2   :  { %2550 = vmatmul.mubr.f32.vlgmr.msra.gmra.mrb[0].mxu0 %v2549_v34 }
 0x5e3   :  { %4304 = vmatpush1.bf16.msra.mxu0 %v5862_v17  ;;  %2700 = vmatprep.mubr.f32.mxu0 %v6353_v14  ;;  %v6396_v17 = vpack.c.bf16 %v5778_v9, %v5771_v61  ;;  %v6401_v61 = vpack.c.bf16 %v5810_v54, %v5805_v31  ;;  %v6402_v9 = vpack.c.bf16 %v5817_v24, %v5812_v7  ;;  %v6412_v31 = vld [vmem:[#allocation43_spill] sm:$0xff]  ;;  %v6413_v54 = vld [vmem:[#allocation44_spill] sm:$0xff]  ;;  %v6414_v7 = vld [vmem:[#allocation45_spill] sm:$0xff] }
 0x5e4   :  { %4306 = vmatprep.subr.bf16.mxu0 %v5866_v60  ;;  %v6397_v60 = vpack.c.bf16 %v5783_v16, %v5780_v30  ;;  %v6403_v30 = vld [vmem:[#allocation35_spill] sm:$0xff]  ;;  %v6415_v24 = vld [vmem:[#allocation46_spill] sm:$0xff] }
 0x5e5   :  { %v6404_v16 = vld [vmem:[#allocation39_spill] sm:$0xff] }
 0x5e7   :  { %4308 = vmatpush1.bf16.msra.mxu0 %v5871_v33  ;;  %v6398_v33 = vpack.c.bf16 %v5789_v3, %v5787_v51  ;;  %v6406_v51 = vld [vmem:[#allocation36_spill] sm:$0xff]  ;;  %v6407_v3 = vld [vmem:[#allocation41_spill] sm:$0xff] }
 0x5e8   :  { %4310 = vmatprep.subr.bf16.mxu0 %v5880_v41  ;;  %v6399_v41 = vpack.c.bf16 %v5798_v43, %v5791_v52  ;;  %v6408_v52 = vld [vmem:[#allocation37_spill] sm:$0xff]  ;;  %v6409_v43 = vld [vmem:[#allocation32_spill] sm:$0xff] }
 0x5eb   :  { %4312 = vmatpush1.bf16.msra.mxu0 %v5886_v15  ;;  %v6416_v15 = vld [vmem:[#allocation47_spill] sm:$0xff] }
 0x5ec   :  { %4314 = vmatprep.subr.bf16.mxu0 %v5888_v32  ;;  %v6417_v32 = vld [vmem:[#allocation48_spill] sm:$0xff] }
 0x5ef   :  { %4316 = vmatpush1.bf16.msra.mxu0 %v5890_v13  ;;  %v6418_v13 = vld [vmem:[#allocation49_spill] sm:$0xff] }
 0x5f0   :  { %4318 = vmatprep.subr.bf16.mxu0 %v6395_v8  ;;  %v3158_v8 = vld [vmem:[#allocation16 + $0x38] sm:$0xff] }
 0x5f2   :  { %2702 = vmatmul.mubr.f32.vlgmr.msra.gmra.mrb[0].mxu0 %v2545_v40 }
 0x5f3   :  { %4320 = vmatpush1.bf16.msra.mxu0 %v6396_v17  ;;  %2804 = vmatprep.mubr.f32.mxu0 %v6353_v14 }
 0x5f4   :  { %4322 = vmatprep.subr.bf16.mxu0 %v6397_v60  ;;  %v3190_v60 = vand.u32 4294901760, %v3158_v8 }
 0x5f7   :  { %4324 = vmatpush1.bf16.msra.mxu0 %v6398_v33 }
 0x5f8   :  { %4326 = vmatprep.subr.bf16.mxu0 %v6399_v41 }
 0x5fb   :  { %4328 = vmatpush1.bf16.msra.mxu0 %v6400_v22 }
 0x5fc   :  { %4330 = vmatprep.subr.bf16.mxu0 %v6401_v61 }
 0x5ff   :  { %4332 = vmatpush1.bf16.msra.mxu0 %v6402_v9 }
 0x600   :  { %4334 = vmatprep.subr.bf16.mxu0 %v6403_v30 }
 0x602   :  { %2807 = vmatmul.mubr.f32.vlgmr.msra.gmra.mrb[0].mxu0 %v2546_v44  ;;  %v3156_v44 = vld [vmem:[#allocation16 + $0x28] sm:$0xff] }
 0x603   :  { %4336 = vmatpush1.bf16.msra.mxu0 %v6404_v16  ;;  %2893 = vmatprep.mubr.f32.mxu0 %v6353_v14  ;;  %v3184_v34 = vand.u32 4294901760, %v3156_v44 }
 0x604   :  { %4338 = vmatprep.subr.bf16.mxu0 %v6405_v4 }
 0x605   :  { %v6138_v22 = vsub.f32 %v3156_v44, %v3184_v34 }
 0x607   :  { %4340 = vmatpush1.bf16.msra.mxu0 %v6406_v51 }
 0x608   :  { %4342 = vmatprep.subr.bf16.mxu0 %v6407_v3 }
 0x60b   :  { %4344 = vmatpush1.bf16.msra.mxu0 %v6408_v52 }
 0x60c   :  { %4346 = vmatprep.subr.bf16.mxu0 %v6409_v43 }
 0x60f   :  { %4348 = vmatpush1.bf16.msra.mxu0 %v6410_v49 }
 0x610   :  { %4350 = vmatprep.subr.bf16.mxu0 %v6411_v20  ;;  %v3268_v20 = vand.u32 4294901760, %v6121_v62 }
 0x612   :  { %2897 = vmatmul.mubr.f32.vlgmr.msra.gmra.mrb[0].mxu0 %v2547_v23  ;;  %v3157_v23 = vld [vmem:[#allocation16 + $0x30] sm:$0xff] }
 0x613   :  { %4352 = vmatpush1.bf16.msra.mxu0 %v6412_v31  ;;  %3015 = vmatprep.mubr.f32.mxu0 %v6353_v14  ;;  %v3187_v17 = vand.u32 4294901760, %v3157_v23  ;;  %v3275_v31 = vand.u32 4294901760, %v6123_v57 }
 0x614   :  { %4354 = vmatprep.subr.bf16.mxu0 %v6413_v54 }
 0x615   :  { %v6140_v61 = vsub.f32 %v3157_v23, %v3187_v17 }
 0x617   :  { %4356 = vmatpush1.bf16.msra.mxu0 %v6414_v7 }
 0x618   :  { %4358 = vmatprep.subr.bf16.mxu0 %v6415_v24  ;;  %v3269_v24 = vsub.f32 %v6121_v62, %v3268_v20 }
 0x61b   :  { %4360 = vmatpush1.bf16.msra.mxu0 %v6416_v15  ;;  %v3128_v46 = vpop.permute.xlu1 %3127  ;;  %v3276_v15 = vsub.f32 %v6123_v57, %v3275_v31 }
 0x61c   :  { %4362 = vmatprep.subr.bf16.mxu0 %v6417_v32 }
 0x61f   :  { %4364 = vmatpush1.bf16.msra.mxu0 %v6418_v13  ;;  %v3270_v13 = vand.u32 4294901760, %v3269_v24 }
 0x620   :  { %4366 = vmatprep.subr.bf16.mxu0 %v6403_v30  ;;  %v6142_v30 = vsub.f32 %v3158_v8, %v3190_v60 }
 0x622   :  { %3017 = vmatmul.mubr.f32.vlgmr.msra.gmra.mrb[0].mxu0 %v2545_v40  ;;  %v4415_v58 = vpack.c.bf16 %v6142_v30, %v6140_v61 }
 0x623   :  { %4368 = vmatpush1.bf16.msra.mxu0 %v6404_v16  ;;  %3103 = vmatprep.mubr.f32.mxu0 %v6353_v14 }
 0x624   :  { %4370 = vmatprep.subr.bf16.mxu0 %v6405_v4  ;;  %v6145_v4 = vpack.c.bf16 %v3190_v60, %v3187_v17 }
 0x627   :  { %4372 = vmatpush1.bf16.msra.mxu0 %v6406_v51 }
 0x628   :  { %4374 = vmatprep.subr.bf16.mxu0 %v6407_v3  ;;  %v3254_v3 = vand.u32 4294901760, %v6117_v5 }
 0x62b   :  { %4376 = vmatpush1.bf16.msra.mxu0 %v6408_v52  ;;  %v3261_v52 = vand.u32 4294901760, %v6119_v29 }
 0x62c   :  { %4378 = vmatprep.subr.bf16.mxu0 %v6409_v43  ;;  %v3255_v43 = vsub.f32 %v6117_v5, %v3254_v3 }
 0x62e   :  { %v3256_v54 = vand.u32 4294901760, %v3255_v43 }
 0x62f   :  { %4380 = vmatpush1.bf16.msra.mxu0 %v6410_v49  ;;  %v3262_v49 = vsub.f32 %v6119_v29, %v3261_v52 }
 0x631   :  { %v3263_v7 = vand.u32 4294901760, %v3262_v49 }
 0x632   :  { %3105 = vmatmul.mubr.f32.vlgmr.msra.gmra.mrb[0].mxu0 %v2545_v40  ;;  %v3155_v40 = vld [vmem:[#allocation16 + $0x20] sm:$0xff] }
 0x633   :  { %v3181_v37 = vand.u32 4294901760, %v3155_v40  ;;  %v4394_v32 = vpack.c.bf16 %v3263_v7, %v3256_v54 }
 0x635   :  { %v6134_v33 = vpack.c.bf16 %v3184_v34, %v3181_v37  ;;  %v6136_v41 = vsub.f32 %v3155_v40, %v3181_v37 }
 0x637   :  { %4389 = vmatpush3.bf16.msra.mxu1 %v6134_v33  ;;  %v4412_v27 = vpack.c.bf16 %v6138_v22, %v6136_v41 }
 0x638   :  { %4390 = vmatprep.subr.bf16.mxu1 %v6419_v25 }
 0x63b   :  { %4392 = vmatpush3.bf16.msra.mxu1 %v6145_v4 }
 0x63c   :  { %4393 = vmatprep.subr.bf16.mxu1 %v6419_v25 }
 0x705   :  { %v3106_v0 = vpop.f32.mrb[0].mxu0 }
 0x706   :  { %v4453_v42 = vadd.f32 %v3106_v0, %v2427_v63  ;;  %v3108_v19 = vpop.f32.mrb[1].mxu0  ;;  %v3277_v63 = vand.u32 4294901760, %v3276_v15  ;;  %v3282_v0 = vand.u32 4294901760, %v6136_v41 }
 0x707   :  { %v4454_v56 = vadd.f32 %v3108_v19, %v2428_v6 }
 0x708   :  { %v3778_v35 = vmul.f32 -1.442695, %v4453_v42  ;;  %v3289_v42 = vand.u32 4294901760, %v6138_v22  ;;  %v4397_v19 = vpack.c.bf16 %v3277_v63, %v3270_v13 }
 0x709   :  { %v3779_v38 = vmul.f32 -1.442695, %v4454_v56 }
 0x70a   :  { %4604 = vpow2.f32 %v3778_v35  ;;  %v3283_v35 = vsub.f32 %v6136_v41, %v3282_v0  ;;  %v3290_v6 = vsub.f32 %v6138_v22, %v3289_v42 }
 0x70b   :  { %4606 = vtanh.f32 %v4454_v56 }
 0x70c   :  { %v3284_v56 = vand.u32 4294901760, %v3283_v35 }
 0x714   :  { %v4605_v50 = vpop.eup %4604 }
 0x715   :  { %v3116_v36 = vadd.f32 1.0, %v4605_v50  ;;  %v4607_v18 = vpop.eup %4606  ;;  %v3296_v50 = vand.u32 4294901760, %v6140_v61 }
 0x717   :  { %4608 = vrcp.f32 %v3116_v36  ;;  %v3303_v36 = vand.u32 4294901760, %v6142_v30 }
 0x718   :  { %4610 = vpow2.f32 %v3779_v38  ;;  %v4430_v38 = vpack.c.bf16 %v3261_v52, %v3254_v3 }
 0x721   :  { %v4609_v11 = vpop.eup %4608 }
 0x722   :  { %v3131_v10 = vmul.f32 %v4609_v11, %v4607_v18  ;;  %v4611_v21 = vpop.eup %4610  ;;  %v3130_v39 = vmul.f32 %v4609_v11, %v3128_v46  ;;  %v3291_v18 = vand.u32 4294901760, %v3290_v6  ;;  %v3297_v11 = vsub.f32 %v6140_v61, %v3296_v50 }
 0x723   :  { %v3123_v26 = vadd.f32 1.0, %v4611_v21  ;;  %v4433_v21 = vpack.c.bf16 %v3275_v31, %v3268_v20  ;;  %v4436_v46 = vpack.c.bf16 %v3289_v42, %v3282_v0 }
 0x724   :  { %3133 = vrot.lane.b32.xlu0 %v3131_v10, %s4919_s9  ;;  %v3304_v10 = vsub.f32 %v6142_v30, %v3303_v36  ;;  %v4400_v53 = vpack.c.bf16 %v3291_v18, %v3284_v56  ;;  %v3298_v48 = vand.u32 4294901760, %v3297_v11 }
 0x725   :  { %4612 = vrcp.f32 %v3123_v26  ;;  %v4439_v26 = vpack.c.bf16 %v3303_v36, %v3296_v50 }
 0x726   :  { %v3305_v45 = vand.u32 4294901760, %v3304_v10 }
 0x728   :  { %v4403_v55 = vpack.c.bf16 %v3305_v45, %v3298_v48 }
 0x72f   :  { %v4613_v9 = vpop.eup %4612 }
 0x796   :  { %v3134_v1 = vpop.permute.xlu0 %3133 }
 0x797   :  { %v6131_v47 = vadd.f32 %v3134_v1, %v3130_v39 }
 0x799   :  { %4614 = vtanh.f32 %v6131_v47 }
 0x7a3   :  { %v4615_v16 = vpop.eup %4614 }
 0x7a4   :  { %v3138_v51 = vmul.f32 %v4615_v16, %v4613_v9 }
 0x7a6   :  { %3140 = vrot.lane.b32.xlu1 %v3138_v51, %s4919_s9 }
 0x818   :  { %v3141_v39 = vpop.permute.xlu1 %3140 }
 0x819   :  { %3143 = vst.msk [vmem:[#allocation2] sm:$0xff] %vm169_vm1, %v3141_v39  ;;  %v3166_v1 = vsel %vm169_vm1, %v3141_v39, 0  ;;  %3149 = vst.msk [vmem:[#allocation21] sm:$0xff] %vm169_vm1, %v3141_v39 }
 0x81a   :  { %v3241_v5 = vand.u32 4294901760, %v3166_v1 }
 0x81c   :  { %v3242_v29 = vsub.f32 %v3166_v1, %v3241_v5 }
 0x81e   :  { %v3243_v62 = vand.u32 4294901760, %v3242_v29 }
 0x820   :  { %v3244_v57 = vsub.f32 %v3242_v29, %v3243_v62 }
 0x822   :  { %v3245_v40 = vand.u32 4294901760, %v3244_v57 }
 0x824   :  { %4020 = vmatmul.mubr.f32.vlgmr.msra.gmra.mrb[2].mxu1 %v3245_v40 }
 0x825   :  { %4395 = vmatpush3.bf16.msra.mxu1 %v4394_v32  ;;  %4038 = vmatprep.mubr.msk.f32.mxu1 %vm4915_vm0, %v6353_v14 }
 0x826   :  { %4396 = vmatprep.subr.bf16.mxu1 %v6419_v25 }
 0x829   :  { %4398 = vmatpush3.bf16.msra.mxu1 %v4397_v19 }
 0x82a   :  { %4399 = vmatprep.subr.bf16.mxu1 %v6419_v25 }
 0x82d   :  { %4401 = vmatpush3.bf16.msra.mxu1 %v4400_v53 }
 0x82e   :  { %4402 = vmatprep.subr.bf16.mxu1 %v6419_v25 }
 0x831   :  { %4404 = vmatpush3.bf16.msra.mxu1 %v4403_v55 }
 0x832   :  { %4405 = vmatprep.subr.bf16.mxu1 %v6419_v25 }
 0x834   :  { %4039 = vmatmul.mubr.f32.vlgmr.msra.gmra.mrb[2].mxu1 %v3241_v5 }
 0x835   :  { %4407 = vmatpush3.bf16.msra.mxu1 %v4406_v28  ;;  %4057 = vmatprep.mubr.msk.f32.mxu1 %vm4915_vm0, %v6353_v14 }
 0x836   :  { %4408 = vmatprep.subr.bf16.mxu1 %v6419_v25 }
 0x839   :  { %4410 = vmatpush3.bf16.msra.mxu1 %v4409_v2 }
 0x83a   :  { %4411 = vmatprep.subr.bf16.mxu1 %v6419_v25 }
 0x83d   :  { %4413 = vmatpush3.bf16.msra.mxu1 %v4412_v27 }
 0x83e   :  { %4414 = vmatprep.subr.bf16.mxu1 %v6419_v25 }
 0x841   :  { %4416 = vmatpush3.bf16.msra.mxu1 %v4415_v58 }
 0x842   :  { %4417 = vmatprep.subr.bf16.mxu1 %v6419_v25 }
 0x844   :  { %4058 = vmatmul.mubr.f32.vlgmr.msra.gmra.mrb[2].mxu1 %v3242_v29 }
 0x845   :  { %4419 = vmatpush3.bf16.msra.mxu1 %v6115_v12  ;;  %4076 = vmatprep.mubr.msk.f32.mxu1 %vm4915_vm0, %v6353_v14 }
 0x846   :  { %4420 = vmatprep.subr.bf16.mxu1 %v6419_v25 }
 0x849   :  { %4422 = vmatpush3.bf16.msra.mxu1 %v6126_v59 }
 0x84a   :  { %4423 = vmatprep.subr.bf16.mxu1 %v6419_v25 }
 0x84d   :  { %4425 = vmatpush3.bf16.msra.mxu1 %v6134_v33 }
 0x84e   :  { %4426 = vmatprep.subr.bf16.mxu1 %v6419_v25 }
 0x851   :  { %4428 = vmatpush3.bf16.msra.mxu1 %v6145_v4 }
 0x852   :  { %4429 = vmatprep.subr.bf16.mxu1 %v6419_v25 }
 0x854   :  { %4077 = vmatmul.mubr.f32.vlgmr.msra.gmra.mrb[2].mxu1 %v3243_v62 }
 0x855   :  { %4431 = vmatpush3.bf16.msra.mxu1 %v4430_v38  ;;  %4095 = vmatprep.mubr.msk.f32.mxu1 %vm4915_vm0, %v6353_v14 }
 0x856   :  { %4432 = vmatprep.subr.bf16.mxu1 %v6419_v25 }
 0x859   :  { %4434 = vmatpush3.bf16.msra.mxu1 %v4433_v21 }
 0x85a   :  { %4435 = vmatprep.subr.bf16.mxu1 %v6419_v25 }
 0x85d   :  { %4437 = vmatpush3.bf16.msra.mxu1 %v4436_v46 }
 0x85e   :  { %4438 = vmatprep.subr.bf16.mxu1 %v6419_v25 }
 0x861   :  { %4440 = vmatpush3.bf16.msra.mxu1 %v4439_v26 }
 0x862   :  { %4441 = vmatprep.subr.bf16.mxu1 %v6419_v25 }
 0x864   :  { %4096 = vmatmul.mubr.f32.vlgmr.msra.gmra.mrb[2].mxu1 %v3241_v5 }
 0x865   :  { %4443 = vmatpush3.bf16.msra.mxu1 %v6115_v12  ;;  %4114 = vmatprep.mubr.msk.f32.mxu1 %vm4915_vm0, %v6353_v14  ;;  %v3780_v12 = vld [vmem:[%s6289_s10] ss:$0 sm:$0xff]  ;;  %s4920_s10 = smov [#allocation19]  }
 0x866   :  { %4444 = vmatprep.subr.bf16.mxu1 %v6419_v25  ;;  %s3733_s29 = sshll.u32 %s4920_s10, 4  ;;  %s3734_s29 = int_to_ptr.vmem [resolvable:$true] %s3733_s29 }
 0x867   :  { %s4796_s17 = scalar_lea.vmem %s3734_s29, 128  ;;  %p4801_p9 = scmp.lt.s32.totalorder %s3734_s29, %s3734_s29 }
 0x868   :  { %p4797_p8 = scmp.ne.s32.totalorder %s3734_s29, %s4796_s17  ;;  %p4802_p10 = scmp.lt.s32.totalorder %s4796_s17, %s4796_s17 }
 0x869   :  { %4446 = vmatpush3.bf16.msra.mxu1 %v6126_v59 }
 0x86a   :  { %4447 = vmatprep.subr.bf16.mxu1 %v6419_v25  ;;  %p4803_p11 = por %p4802_p10, %p4801_p9 }
 0x86c   :  { %p4804_p12 = pnand %p4803_p11, %p4797_p8 }
 0x86d   :  { %4449 = vmatpush3.bf16.msra.mxu1 %v6134_v33 }
 0x86e   :  { %4450 = vmatprep.subr.bf16.mxu1 %v6419_v25 }
 0x871   :  { %4452 = vmatpush3.bf16.msra.mxu1 %v6145_v4 }
 0x874   :  { %4115 = vmatmul.mubr.f32.vlgmr.msra.gmra.mrb[2].mxu1 %v3241_v5 }
 0x947   :  { %v3701_v44 = vpop.f32.mrb[2].mxu1 }
 0x948   :  { %v6218_v23 = vadd.f32 %v3780_v12, %v3701_v44  ;;  %v4116_v14 = vpop.f32.mrb[3].mxu1 }
 0x94a   :  { %3705 = vmax.xlane.f32.xlu0 %v6218_v23 }
 0x960   :  { %3145 = vrot.lane.b32.xlu0 %v6131_v47, %s4919_s9 }
 0x9d7   :  { %v6223_v59 = vpop.xlane.xlu0 %3705 }
 0x9d8   :  { %v3707_v25 = vsub.f32 %v6218_v23, %v6223_v59 }
 0x9da   :  { %v3708_v37 = vmul.f32 1.442695, %v3707_v25 }
 0x9db   :  { %v3146_v34 = vpop.permute.xlu0 %3145 }
 0x9dc   :  { %4616 = vpow2.f32 %v3708_v37  ;;  %3148 = vst.msk [vmem:[#allocation3] sm:$0xff] %vm169_vm1, %v3146_v34  ;;  %3150 = vst.msk [vmem:[#allocation22] sm:$0xff] %vm169_vm1, %v3146_v34 }
 0x9e6   :  { %v4617_v8 = vpop.eup %4616 }
 0x9e7   :  { %3710 = vadd.xlane.f32.xlu1 %v4617_v8 }
 0x9e8   :  { %4807 = shalt.err (!%p4804_p12)
}
 0x9e9   :  { %s4808_s15 = scalar_lea.hbm %s6291_s12, 128 }
 0x9ea   :  { %p4809_p13 = scmp.ne.s32.totalorder %s6291_s12, %s4808_s15  ;;  %p4812_p0 = scmp.lt.u32.totalorder %s4808_s15, %s6291_s12 }
 0x9ec   :  { %p4814_p1 = pnand %p4812_p0, %p4809_p13 }
 0x9ee   :  { %4817 = shalt.err (!%p4814_p1)
}
 0x9ef   :  { %3736 = dma.vmem_to_hbm [thread:$0]  %s3734_s29, 128, %s6291_s12, [#allocation20]  }
 0x9f0   :  { %s4921_s2 = smov [#allocation21]  }
 0x9f1   :  { %s3743_s25 = sshll.u32 %s4921_s2, 4  ;;  %s3744_s25 = int_to_ptr.vmem [resolvable:$true] %s3743_s25 }
 0x9f2   :  { %s4818_s23 = scalar_lea.vmem %s3744_s25, 128  ;;  %p4823_p3 = scmp.lt.s32.totalorder %s3744_s25, %s3744_s25 }
 0x9f3   :  { %p4819_p2 = scmp.ne.s32.totalorder %s3744_s25, %s4818_s23  ;;  %p4824_p4 = scmp.lt.s32.totalorder %s4818_s23, %s4818_s23 }
 0x9f5   :  { %p4825_p5 = por %p4824_p4, %p4823_p3 }
 0x9f7   :  { %p4826_p6 = pnand %p4825_p5, %p4819_p2 }
 0x9f9   :  { %4829 = shalt.err (!%p4826_p6)
}
 0x9fa   :  { %s4830_s28 = scalar_lea.hbm %s6292_s13, 128 }
 0x9fb   :  { %p4831_p7 = scmp.ne.s32.totalorder %s6292_s13, %s4830_s28  ;;  %p4834_p8 = scmp.lt.u32.totalorder %s4830_s28, %s6292_s13 }
 0x9fd   :  { %p4836_p9 = pnand %p4834_p8, %p4831_p7 }
 0x9ff   :  { %4839 = shalt.err (!%p4836_p9)
}
 0xa00   :  { %3746 = dma.vmem_to_hbm [thread:$0]  %s3744_s25, 128, %s6292_s13, [#allocation20]  }
 0xa01   :  { %s4922_s30 = smov [#allocation22]  }
 0xa02   :  { %s3753_s9 = sshll.u32 %s4922_s30, 4  ;;  %s3754_s9 = int_to_ptr.vmem [resolvable:$true] %s3753_s9 }
 0xa03   :  { %s4840_s0 = scalar_lea.vmem %s3754_s9, 128  ;;  %p4845_p11 = scmp.lt.s32.totalorder %s3754_s9, %s3754_s9 }
 0xa04   :  { %p4841_p10 = scmp.ne.s32.totalorder %s3754_s9, %s4840_s0  ;;  %p4846_p12 = scmp.lt.s32.totalorder %s4840_s0, %s4840_s0 }
 0xa06   :  { %p4847_p13 = por %p4846_p12, %p4845_p11 }
 0xa08   :  { %p4848_p0 = pnand %p4847_p13, %p4841_p10 }
 0xa0a   :  { %4851 = shalt.err (!%p4848_p0)
}
 0xa0b   :  { %s4852_s29 = scalar_lea.hbm %s6293_s14, 128 }
 0xa0c   :  { %p4853_p1 = scmp.ne.s32.totalorder %s6293_s14, %s4852_s29  ;;  %p4856_p2 = scmp.lt.u32.totalorder %s4852_s29, %s6293_s14 }
 0xa0e   :  { %p4858_p3 = pnand %p4856_p2, %p4853_p1 }
 0xa10   :  { %4861 = shalt.err (!%p4858_p3)
}
 0xa11   :  { %3756 = dma.vmem_to_hbm [thread:$0]  %s3754_s9, 128, %s6293_s14, [#allocation23]  }
 0xa12   :  { %s4923_s3 = smov [#allocation18]  }
 0xa13   :  { %s3723_s16 = sshll.u32 %s4923_s3, 4  ;;  %s3724_s16 = int_to_ptr.vmem [resolvable:$true] %s3723_s16 }
 0xa14   :  { %s4862_s19 = scalar_lea.vmem %s3724_s16, 128  ;;  %p4867_p5 = scmp.lt.s32.totalorder %s3724_s16, %s3724_s16 }
 0xa15   :  { %p4863_p4 = scmp.ne.s32.totalorder %s3724_s16, %s4862_s19  ;;  %p4868_p6 = scmp.lt.s32.totalorder %s4862_s19, %s4862_s19 }
 0xa17   :  { %p4869_p7 = por %p4868_p6, %p4867_p5 }
 0xa19   :  { %p4870_p8 = pnand %p4869_p7, %p4863_p4 }
 0xa74   :  { %v3711_v47 = vpop.xlane.xlu1 %3710 }
 0xa75   :  { %4618 = vlog2.f32 %v3711_v47 }
 0xa7f   :  { %v4619_v17 = vpop.eup %4618 }
 0xa80   :  { %v3713_v60 = vmul.f32 0.6931472, %v4619_v17 }
 0xa82   :  { %v3714_v33 = vadd.f32 %v3713_v60, %v6223_v59 }
 0xa84   :  { %v3715_v41 = vsub.f32 %v6218_v23, %v3714_v33 }
 0xa86   :  { %3716 = vst [vmem:[#allocation18] sm:$0xff] %v3715_v41 }
 0xa87   :  { %4873 = shalt.err (!%p4870_p8)
}
 0xa88   :  { %s4874_s21 = scalar_lea.hbm %s6290_s11, 128 }
 0xa89   :  { %p4875_p9 = scmp.ne.s32.totalorder %s6290_s11, %s4874_s21  ;;  %p4878_p10 = scmp.lt.u32.totalorder %s4874_s21, %s6290_s11 }
 0xa8b   :  { %p4880_p11 = pnand %p4878_p10, %p4875_p9 }
 0xa8d   :  { %4883 = shalt.err (!%p4880_p11)
}
 0xa8e   :  { %3726 = dma.vmem_to_hbm [thread:$0]  %s3724_s16, 128, %s6290_s11, [#allocation6]  }
 0xa8f   :  { %4894 = dma.done.wait [#allocation6], 128  }
 0xa90   :  { %4895 = vsyncadd [#allocation6], 4294967168 }
 0xa91   :  { %4896 = dma.done.wait [#allocation20], 256  }
 0xa92   :  { %4897 = vsyncadd [#allocation20], 4294967040 }
 0xa93   :  { %4898 = dma.done.wait [#allocation23], 128  }
 0xa94   :  { %4899 = vsyncadd [#allocation23], 4294967168 }
 0xa95   :  { %3769 = vsyncpa [#allocation5], 1 }
 0xa96   :  { %3770 = vsyncpa [#allocation8], 1 }
 0xa97   :  { %3771 = vsyncpa [#allocation11], 1 }
 0xa98   :  { %3772 = vsyncpa [#allocation14], 1 }
 0xa99   :  { %3773 = vsyncpa [#allocation17], 1 }
 0xa9a   :  { %3774 = vsyncpa [#allocation6], 1 }
 0xa9b   :  { %3775 = vsyncpa [#allocation20], 1 }
 0xa9c   :  { %3776 = vsyncpa [#allocation23], 1 }

</bundles_post_ra>
